<compile_context>
chip_gen: v7x
topology: tpu7x:2x2x1
jax: 0.10.0
libtpu: 0.0.40
codegen_flags: <defaults>
</compile_context>

<pallas_src>
import numpy as np

import jax
import jax.numpy as jnp
from jax.experimental import pallas as pl
from jax.experimental.pallas import tpu as pltpu


# (kind, kernel_size, stride, padding, batchnorm, activation)
_LAYERS = (
    ("conv",  4, 2, 1, False, "leaky"),
    ("conv",  4, 2, 1, True,  "leaky"),
    ("conv",  5, 3, 1, True,  "leaky"),
    ("convT", 5, 3, 1, True,  "relu"),
    ("convT", 4, 2, 1, True,  "relu"),
    ("convT", 4, 2, 1, False, "tanh"),
)
_NUM_LAYERS = len(_LAYERS)
_BN_EPS = 1e-5
_LEAKY_SLOPE = 0.2


def _out_len(kind, l_in, k, s, p):
    if kind == "conv":
        return (l_in + 2 * p - k) // s + 1
    return (l_in - 1) * s - 2 * p + k


def _prep_weight(kind, w):
    """PyTorch conv weight -> concatenated-tap (C_out, k*C_in) bf16.

    Column index = t*C_in + c, matching the tap-stacked operand built in the
    kernel (rows [t*C_in:(t+1)*C_in] hold tap t).
    """
    if kind == "conv":                        # Conv1d weight: (C_out, C_in, k)
        wc = jnp.transpose(w, (0, 2, 1))      # -> (C_out, k, C_in)
    else:                                     # ConvTranspose1d: (C_in, C_out, k)
        wc = jnp.transpose(w, (1, 2, 0))      # -> (C_out, k, C_in)
    return wc.reshape(wc.shape[0], -1).astype(jnp.bfloat16)


def _prep_gather(kind, k, s, p, l_in):
    """Per-batch constant 0/1 gather (conv) / scatter (convT) matrix.

    Shape (L_in, k*L_out), tap-major columns: column t*L_out + l of the
    product h_b @ M picks h_b[:, s*l + t - p] (conv) or scatters position j to
    s*j + t - p (convT); out-of-range taps are zero (zero padding / cropping).
    """
    l_out = _out_len(kind, l_in, k, s, p)
    M = np.zeros((l_in, k * l_out), np.float32)
    for t in range(k):
        off = t - p
        if kind == "conv":
            for l in range(l_out):
                j = s * l + off
                if 0 <= j < l_in:
                    M[j, t * l_out + l] = 1.0
        else:
            for j in range(l_in):
                m = s * j + off
                if 0 <= m < l_out:
                    M[j, t * l_out + m] = 1.0
    return jnp.asarray(M, jnp.bfloat16), l_out


# ----------------------------------------------------------------------------
# The single fused Pallas kernel (whole 6-layer network, one invocation)
# ----------------------------------------------------------------------------
def _make_kernel(B, meta):
    n = _NUM_LAYERS

    def kernel(x_ref, *refs):
        w_refs = refs[:n]                    # (C_out, k*C_in) bf16 per layer
        m_refs = refs[n:2 * n]               # (L_in, k*L_out) bf16 per layer
        o_ref = refs[2 * n]                  # (B, C_in, L) f32 output
        stage = refs[2 * n + 1]              # (B, max_rows, max_cols) bf16 scratch

        # per-batch activations, kept resident on-chip for all 6 layers
        hs = [x_ref[b] for b in range(B)]    # bf16 (C_in, L) each

        for li, (k, c_in, l_out, bn, act) in enumerate(meta):
            w = w_refs[li][...]              # (C_out, k*c_in) bf16
            m = m_refs[li][...]              # (l_in, k*l_out) bf16

            ys = []
            for b in range(B):
                hb = hs[b].astype(jnp.bfloat16)          # single cast per layer
                # (1) one lane-dense gather matmul for all taps at once
                xg = jnp.dot(hb, m, preferred_element_type=jnp.float32
                             ).astype(jnp.bfloat16)      # (c_in, k*l_out)
                # restack taps onto sublanes via the staging scratch
                for t in range(k):
                    stage[b, t * c_in:(t + 1) * c_in, 0:l_out] = \
                        xg[:, t * l_out:(t + 1) * l_out]
                xs = stage[b, 0:k * c_in, 0:l_out]       # (k*c_in, l_out) bf16
                # (2) one big-K channel-mix matmul
                ys.append(jnp.dot(w, xs,
                                  preferred_element_type=jnp.float32))

            if bn:
                # training-mode BatchNorm1d: two-pass stats per channel over
                # (batch, length), gamma=1, beta=0 (fresh PyTorch init).
                cnt = B * l_out
                mean = sum(jnp.sum(y, axis=1, keepdims=True) for y in ys) / cnt
                var = sum(jnp.sum((y - mean) ** 2, axis=1, keepdims=True)
                          for y in ys) / cnt
                inv = jax.lax.rsqrt(var + _BN_EPS)
                ys = [(y - mean) * inv for y in ys]

            if act == "leaky":
                ys = [jnp.where(y > 0, y, _LEAKY_SLOPE * y) for y in ys]
            elif act == "relu":
                ys = [jnp.maximum(y, 0.0) for y in ys]
            else:  # tanh
                ys = [jnp.tanh(y) for y in ys]

            hs = ys

        for b in range(B):
            o_ref[b] = hs[b].astype(o_ref.dtype)

    return kernel


def kpi_reconstructor_forward(x_bf16, w_cats, m_cats):
    """x_bf16: (B, C_in, L) bf16.  w_cats / m_cats: prepped per-layer constants."""
    B, C_in, L = x_bf16.shape

    # static per-layer metadata: (k, in_channels, out_length, bn, act)
    meta = []
    l_in, c = L, C_in
    for (kind, k, s, p, bn, act), w in zip(_LAYERS, w_cats):
        l_out = _out_len(kind, l_in, k, s, p)
        meta.append((k, c, l_out, bn, act))
        l_in, c = l_out, int(w.shape[0])
    assert l_in == L and c == C_in, "encoder/decoder round-trip mismatch"
    meta = tuple(meta)

    max_rows = max(k * ci for k, ci, _, _, _ in meta)
    max_cols = max(lo for _, _, lo, _, _ in meta)

    operands = (x_bf16, *w_cats, *m_cats)

    # explicit VMEM budget: operands + output + generous headroom for f32
    # activations/relayouts; never below the default scoped limit, capped so
    # it stays legal on v7x (64 MiB physical).
    in_bytes = sum(int(np.prod(a.shape)) * a.dtype.itemsize for a in operands)
    out_bytes = B * C_in * L * 4
    vmem_limit = int(min(max(8 * (in_bytes + out_bytes) + (1 << 20),
                             32 * 1024 * 1024),
                         64 * 1024 * 1024))

    # grid-less pallas_call: whole arrays resident in VMEM, single-buffered
    # (no pipeline exists on a length-1 grid, so no double buffering).
    return pl.pallas_call(
        _make_kernel(B, meta),
        out_shape=jax.ShapeDtypeStruct((B, C_in, L), jnp.float32),
        scratch_shapes=[pltpu.VMEM((B, max_rows, max_cols), jnp.bfloat16)],
        compiler_params=pltpu.CompilerParams(vmem_limit_bytes=vmem_limit),
    )(*operands)


# ----------------------------------------------------------------------------
# Model wrapper (PyTorch-layout parameters; constants prepped once)
# ----------------------------------------------------------------------------
class KPIReconstructorPallas:
    def __init__(self, c_in, freq_cout, key):
        F = freq_cout
        ks = jax.random.split(key, 6)

        def init(k, shape):
            return jax.random.normal(k, shape, jnp.float32) * 0.05

        # raw PyTorch-layout weights (kept in f32 for the reference check)
        self.weights = (
            init(ks[0], (F, c_in, 4)),          # Conv1d
            init(ks[1], (2 * F, F, 4)),         # Conv1d
            init(ks[2], (4 * F, 2 * F, 5)),     # Conv1d
            init(ks[3], (4 * F, 2 * F, 5)),     # ConvTranspose1d
            init(ks[4], (2 * F, F, 4)),         # ConvTranspose1d
            init(ks[5], (F, c_in, 4)),          # ConvTranspose1d
        )
        # prepped once: bf16 concatenated-tap weights
        self.w_cats = tuple(_prep_weight(kind, w)
                            for (kind, *_), w in zip(_LAYERS, self.weights))
        # per-batch gather constants depend only on L -> cache per length
        self._m_cache = {}

    def _m_cats(self, L):
        if L not in self._m_cache:
            ms, l = [], L
            for (kind, k, s, p, _, _) in _LAYERS:
                m, l = _prep_gather(kind, k, s, p, l)
                ms.append(m)
            self._m_cache[L] = tuple(ms)
        return self._m_cache[L]

    def __call__(self, x):
        return kpi_reconstructor_forward(x.astype(jnp.bfloat16),
                                         self.w_cats, self._m_cats(x.shape[2]))


# ----------------------------------------------------------------------------
# Pure-JAX f32 reference (PyTorch semantics) for a self-check
# ----------------------------------------------------------------------------
def _ref_conv1d(x, w, k, s, p):
    B, C_in, L = x.shape
    xp = jnp.pad(x, ((0, 0), (0, 0), (p, p)))
    L_out = (L + 2 * p - k) // s + 1
    idx = np.arange(L_out)[:, None] * s + np.arange(k)[None, :]
    patches = xp[:, :, idx]                          # (B, C_in, L_out, k)
    return jnp.einsum("bclk,ock->bol", patches, w)


def _ref_convT1d(x, w, k, s, p):
    B, C_in, L = x.shape
    xd = jnp.zeros((B, C_in, (L - 1) * s + 1), x.dtype).at[:, :, ::s].set(x)
    w_eq = jnp.flip(w, axis=2).transpose(1, 0, 2)    # (C_out, C_in, k)
    return _ref_conv1d(xd, w_eq, k, 1, k - 1 - p)


def _ref_forward(x, weights):
    h = x
    for (kind, k, s, p, bn, act), w in zip(_LAYERS, weights):
        h = _ref_conv1d(h, w, k, s, p) if kind == "conv" else _ref_convT1d(h, w, k, s, p)
        if bn:
            mean = jnp.mean(h, axis=(0, 2), keepdims=True)
            var = jnp.mean((h - mean) ** 2, axis=(0, 2), keepdims=True)
            h = (h - mean) * jax.lax.rsqrt(var + _BN_EPS)
        if act == "leaky":
            h = jnp.where(h > 0, h, _LEAKY_SLOPE * h)
        elif act == "relu":
            h = jnp.maximum(h, 0.0)
        else:
            h = jnp.tanh(h)
    return h


if __name__ == "__main__":
    key = jax.random.PRNGKey(0)
    pkey, xkey = jax.random.split(key)

    # L=48 round-trips exactly: 48 -> 24 -> 12 -> 4 -> 12 -> 24 -> 48
    B, C_IN, L, FREQ_COUT = 2, 4, 48, 8
    model = KPIReconstructorPallas(C_IN, FREQ_COUT, pkey)
    x = jax.random.normal(xkey, (B, C_IN, L), jnp.float32)

    fwd = jax.jit(model.__call__)
    x_rec = fwd(x)
    jax.block_until_ready(x_rec)

    assert x_rec.shape == (B, C_IN, L), x_rec.shape
    assert bool(jnp.all(jnp.isfinite(x_rec)))

    # self-check against an f32 pure-JAX reference (bf16 MXU tolerance)
    x_ref = jax.jit(_ref_forward)(x, model.weights)
    max_err = float(jnp.max(jnp.abs(x_rec - x_ref)))
    assert max_err < 0.1, f"max abs err vs reference: {max_err}"

    print("KERNEL_OK")
</pallas_src>

<mosaic_0001>
module attributes {stable_mosaic.version = 11 : i64} {
  func.func @kernel(%arg0: memref<2x4x48xbf16, #tpu.memory_space<vmem>>, %arg1: memref<8x16xbf16, #tpu.memory_space<vmem>>, %arg2: memref<16x32xbf16, #tpu.memory_space<vmem>>, %arg3: memref<32x80xbf16, #tpu.memory_space<vmem>>, %arg4: memref<16x160xbf16, #tpu.memory_space<vmem>>, %arg5: memref<8x64xbf16, #tpu.memory_space<vmem>>, %arg6: memref<4x32xbf16, #tpu.memory_space<vmem>>, %arg7: memref<48x96xbf16, #tpu.memory_space<vmem>>, %arg8: memref<24x48xbf16, #tpu.memory_space<vmem>>, %arg9: memref<12x20xbf16, #tpu.memory_space<vmem>>, %arg10: memref<4x60xbf16, #tpu.memory_space<vmem>>, %arg11: memref<12x96xbf16, #tpu.memory_space<vmem>>, %arg12: memref<24x192xbf16, #tpu.memory_space<vmem>>, %arg13: memref<2x4x48xf32, #tpu.memory_space<vmem>>, %arg14: memref<2x160x48xbf16, #tpu.memory_space<vmem>>) attributes {dimension_semantics = [], scalar_prefetch = 0 : i64, scratch_operands = 1 : i64, tpu.core_type = #tpu.core_type<tc>} {
    %c0 = arith.constant 0 : index
    %c0_0 = arith.constant 0 : index
    %c0_1 = arith.constant 0 : index
    %0 = vector.load %arg0[%c0, %c0_0, %c0_1] : memref<2x4x48xbf16, #tpu.memory_space<vmem>>, vector<1x4x48xbf16>
    %1 = vector.shape_cast %0 : vector<1x4x48xbf16> to vector<4x48xbf16>
    %c1 = arith.constant 1 : index
    %c0_2 = arith.constant 0 : index
    %c0_3 = arith.constant 0 : index
    %2 = vector.load %arg0[%c1, %c0_2, %c0_3] : memref<2x4x48xbf16, #tpu.memory_space<vmem>>, vector<1x4x48xbf16>
    %3 = vector.shape_cast %2 : vector<1x4x48xbf16> to vector<4x48xbf16>
    %c0_4 = arith.constant 0 : index
    %c0_5 = arith.constant 0 : index
    %4 = vector.load %arg1[%c0_4, %c0_5] : memref<8x16xbf16, #tpu.memory_space<vmem>>, vector<8x16xbf16>
    %c0_6 = arith.constant 0 : index
    %c0_7 = arith.constant 0 : index
    %5 = vector.load %arg7[%c0_6, %c0_7] : memref<48x96xbf16, #tpu.memory_space<vmem>>, vector<48x96xbf16>
    %cst = arith.constant dense<0.000000e+00> : vector<4x96xf32>
    %6 = tpu.matmul %1, %5, %cst {dimension_numbers = #tpu.dot_dimension_numbers<[1], [0], [0], [1], [0, 0, 1, 1], [], []>} : vector<4x48xbf16>, vector<48x96xbf16>, vector<4x96xf32> -> vector<4x96xf32>
    %7 = arith.truncf %6 : vector<4x96xf32> to vector<4x96xbf16>
    %8 = vector.extract_strided_slice %7 {offsets = [0, 0], sizes = [4, 24], strides = [1, 1]} : vector<4x96xbf16> to vector<4x24xbf16>
    %c0_8 = arith.constant 0 : index
    %c0_9 = arith.constant 0 : index
    %c0_10 = arith.constant 0 : index
    %9 = vector.load %arg14[%c0_8, %c0_9, %c0_10] : memref<2x160x48xbf16, #tpu.memory_space<vmem>>, vector<1x4x24xbf16>
    %10 = vector.shape_cast %9 : vector<1x4x24xbf16> to vector<4x24xbf16>
    %11 = vector.shape_cast %8 : vector<4x24xbf16> to vector<1x4x24xbf16>
    tpu.vector_store %arg14[%c0_8, %c0_9, %c0_10], %11 {strides = array<i32>} : memref<2x160x48xbf16, #tpu.memory_space<vmem>>, vector<1x4x24xbf16>,
    %12 = vector.extract_strided_slice %7 {offsets = [0, 24], sizes = [4, 24], strides = [1, 1]} : vector<4x96xbf16> to vector<4x24xbf16>
    %c0_11 = arith.constant 0 : index
    %c4 = arith.constant 4 : index
    %c0_12 = arith.constant 0 : index
    %13 = vector.load %arg14[%c0_11, %c4, %c0_12] : memref<2x160x48xbf16, #tpu.memory_space<vmem>>, vector<1x4x24xbf16>
    %14 = vector.shape_cast %13 : vector<1x4x24xbf16> to vector<4x24xbf16>
    %15 = vector.shape_cast %12 : vector<4x24xbf16> to vector<1x4x24xbf16>
    tpu.vector_store %arg14[%c0_11, %c4, %c0_12], %15 {strides = array<i32>} : memref<2x160x48xbf16, #tpu.memory_space<vmem>>, vector<1x4x24xbf16>,
    %16 = vector.extract_strided_slice %7 {offsets = [0, 48], sizes = [4, 24], strides = [1, 1]} : vector<4x96xbf16> to vector<4x24xbf16>
    %c0_13 = arith.constant 0 : index
    %c8 = arith.constant 8 : index
    %c0_14 = arith.constant 0 : index
    %17 = vector.load %arg14[%c0_13, %c8, %c0_14] : memref<2x160x48xbf16, #tpu.memory_space<vmem>>, vector<1x4x24xbf16>
    %18 = vector.shape_cast %17 : vector<1x4x24xbf16> to vector<4x24xbf16>
    %19 = vector.shape_cast %16 : vector<4x24xbf16> to vector<1x4x24xbf16>
    tpu.vector_store %arg14[%c0_13, %c8, %c0_14], %19 {strides = array<i32>} : memref<2x160x48xbf16, #tpu.memory_space<vmem>>, vector<1x4x24xbf16>,
    %20 = vector.extract_strided_slice %7 {offsets = [0, 72], sizes = [4, 24], strides = [1, 1]} : vector<4x96xbf16> to vector<4x24xbf16>
    %c0_15 = arith.constant 0 : index
    %c12 = arith.constant 12 : index
    %c0_16 = arith.constant 0 : index
    %21 = vector.load %arg14[%c0_15, %c12, %c0_16] : memref<2x160x48xbf16, #tpu.memory_space<vmem>>, vector<1x4x24xbf16>
    %22 = vector.shape_cast %21 : vector<1x4x24xbf16> to vector<4x24xbf16>
    %23 = vector.shape_cast %20 : vector<4x24xbf16> to vector<1x4x24xbf16>
    tpu.vector_store %arg14[%c0_15, %c12, %c0_16], %23 {strides = array<i32>} : memref<2x160x48xbf16, #tpu.memory_space<vmem>>, vector<1x4x24xbf16>,
    %c0_17 = arith.constant 0 : index
    %c0_18 = arith.constant 0 : index
    %c0_19 = arith.constant 0 : index
    %24 = vector.load %arg14[%c0_17, %c0_18, %c0_19] : memref<2x160x48xbf16, #tpu.memory_space<vmem>>, vector<1x16x24xbf16>
    %25 = vector.shape_cast %24 : vector<1x16x24xbf16> to vector<16x24xbf16>
    %cst_20 = arith.constant dense<0.000000e+00> : vector<8x24xf32>
    %26 = tpu.matmul %4, %25, %cst_20 {dimension_numbers = #tpu.dot_dimension_numbers<[1], [0], [0], [1], [0, 0, 1, 1], [], []>} : vector<8x16xbf16>, vector<16x24xbf16>, vector<8x24xf32> -> vector<8x24xf32>
    %cst_21 = arith.constant dense<0.000000e+00> : vector<4x96xf32>
    %27 = tpu.matmul %3, %5, %cst_21 {dimension_numbers = #tpu.dot_dimension_numbers<[1], [0], [0], [1], [0, 0, 1, 1], [], []>} : vector<4x48xbf16>, vector<48x96xbf16>, vector<4x96xf32> -> vector<4x96xf32>
    %28 = arith.truncf %27 : vector<4x96xf32> to vector<4x96xbf16>
    %29 = vector.extract_strided_slice %28 {offsets = [0, 0], sizes = [4, 24], strides = [1, 1]} : vector<4x96xbf16> to vector<4x24xbf16>
    %c1_22 = arith.constant 1 : index
    %c0_23 = arith.constant 0 : index
    %c0_24 = arith.constant 0 : index
    %30 = vector.load %arg14[%c1_22, %c0_23, %c0_24] : memref<2x160x48xbf16, #tpu.memory_space<vmem>>, vector<1x4x24xbf16>
    %31 = vector.shape_cast %30 : vector<1x4x24xbf16> to vector<4x24xbf16>
    %32 = vector.shape_cast %29 : vector<4x24xbf16> to vector<1x4x24xbf16>
    tpu.vector_store %arg14[%c1_22, %c0_23, %c0_24], %32 {strides = array<i32>} : memref<2x160x48xbf16, #tpu.memory_space<vmem>>, vector<1x4x24xbf16>,
    %33 = vector.extract_strided_slice %28 {offsets = [0, 24], sizes = [4, 24], strides = [1, 1]} : vector<4x96xbf16> to vector<4x24xbf16>
    %c1_25 = arith.constant 1 : index
    %c4_26 = arith.constant 4 : index
    %c0_27 = arith.constant 0 : index
    %34 = vector.load %arg14[%c1_25, %c4_26, %c0_27] : memref<2x160x48xbf16, #tpu.memory_space<vmem>>, vector<1x4x24xbf16>
    %35 = vector.shape_cast %34 : vector<1x4x24xbf16> to vector<4x24xbf16>
    %36 = vector.shape_cast %33 : vector<4x24xbf16> to vector<1x4x24xbf16>
    tpu.vector_store %arg14[%c1_25, %c4_26, %c0_27], %36 {strides = array<i32>} : memref<2x160x48xbf16, #tpu.memory_space<vmem>>, vector<1x4x24xbf16>,
    %37 = vector.extract_strided_slice %28 {offsets = [0, 48], sizes = [4, 24], strides = [1, 1]} : vector<4x96xbf16> to vector<4x24xbf16>
    %c1_28 = arith.constant 1 : index
    %c8_29 = arith.constant 8 : index
    %c0_30 = arith.constant 0 : index
    %38 = vector.load %arg14[%c1_28, %c8_29, %c0_30] : memref<2x160x48xbf16, #tpu.memory_space<vmem>>, vector<1x4x24xbf16>
    %39 = vector.shape_cast %38 : vector<1x4x24xbf16> to vector<4x24xbf16>
    %40 = vector.shape_cast %37 : vector<4x24xbf16> to vector<1x4x24xbf16>
    tpu.vector_store %arg14[%c1_28, %c8_29, %c0_30], %40 {strides = array<i32>} : memref<2x160x48xbf16, #tpu.memory_space<vmem>>, vector<1x4x24xbf16>,
    %41 = vector.extract_strided_slice %28 {offsets = [0, 72], sizes = [4, 24], strides = [1, 1]} : vector<4x96xbf16> to vector<4x24xbf16>
    %c1_31 = arith.constant 1 : index
    %c12_32 = arith.constant 12 : index
    %c0_33 = arith.constant 0 : index
    %42 = vector.load %arg14[%c1_31, %c12_32, %c0_33] : memref<2x160x48xbf16, #tpu.memory_space<vmem>>, vector<1x4x24xbf16>
    %43 = vector.shape_cast %42 : vector<1x4x24xbf16> to vector<4x24xbf16>
    %44 = vector.shape_cast %41 : vector<4x24xbf16> to vector<1x4x24xbf16>
    tpu.vector_store %arg14[%c1_31, %c12_32, %c0_33], %44 {strides = array<i32>} : memref<2x160x48xbf16, #tpu.memory_space<vmem>>, vector<1x4x24xbf16>,
    %c1_34 = arith.constant 1 : index
    %c0_35 = arith.constant 0 : index
    %c0_36 = arith.constant 0 : index
    %45 = vector.load %arg14[%c1_34, %c0_35, %c0_36] : memref<2x160x48xbf16, #tpu.memory_space<vmem>>, vector<1x16x24xbf16>
    %46 = vector.shape_cast %45 : vector<1x16x24xbf16> to vector<16x24xbf16>
    %cst_37 = arith.constant dense<0.000000e+00> : vector<8x24xf32>
    %47 = tpu.matmul %4, %46, %cst_37 {dimension_numbers = #tpu.dot_dimension_numbers<[1], [0], [0], [1], [0, 0, 1, 1], [], []>} : vector<8x16xbf16>, vector<16x24xbf16>, vector<8x24xf32> -> vector<8x24xf32>
    %cst_38 = arith.constant 0.000000e+00 : f32
    %48 = vector.broadcast %cst_38 : f32 to vector<8x24xf32>
    %49 = arith.cmpf ogt, %26, %48 : vector<8x24xf32>
    %cst_39 = arith.constant 2.000000e-01 : f32
    %50 = vector.broadcast %cst_39 : f32 to vector<8x24xf32>
    %51 = arith.mulf %50, %26 : vector<8x24xf32>
    %52 = arith.select %49, %26, %51 : vector<8x24xi1>, vector<8x24xf32>
    %cst_40 = arith.constant 0.000000e+00 : f32
    %53 = vector.broadcast %cst_40 : f32 to vector<8x24xf32>
    %54 = arith.cmpf ogt, %47, %53 : vector<8x24xf32>
    %cst_41 = arith.constant 2.000000e-01 : f32
    %55 = vector.broadcast %cst_41 : f32 to vector<8x24xf32>
    %56 = arith.mulf %55, %47 : vector<8x24xf32>
    %57 = arith.select %54, %47, %56 : vector<8x24xi1>, vector<8x24xf32>
    %c0_42 = arith.constant 0 : index
    %c0_43 = arith.constant 0 : index
    %58 = vector.load %arg2[%c0_42, %c0_43] : memref<16x32xbf16, #tpu.memory_space<vmem>>, vector<16x32xbf16>
    %c0_44 = arith.constant 0 : index
    %c0_45 = arith.constant 0 : index
    %59 = vector.load %arg8[%c0_44, %c0_45] : memref<24x48xbf16, #tpu.memory_space<vmem>>, vector<24x48xbf16>
    %60 = arith.truncf %52 : vector<8x24xf32> to vector<8x24xbf16>
    %cst_46 = arith.constant dense<0.000000e+00> : vector<8x48xf32>
    %61 = tpu.matmul %60, %59, %cst_46 {dimension_numbers = #tpu.dot_dimension_numbers<[1], [0], [0], [1], [0, 0, 1, 1], [], []>} : vector<8x24xbf16>, vector<24x48xbf16>, vector<8x48xf32> -> vector<8x48xf32>
    %62 = arith.truncf %61 : vector<8x48xf32> to vector<8x48xbf16>
    %63 = vector.extract_strided_slice %62 {offsets = [0, 0], sizes = [8, 12], strides = [1, 1]} : vector<8x48xbf16> to vector<8x12xbf16>
    %c0_47 = arith.constant 0 : index
    %c0_48 = arith.constant 0 : index
    %c0_49 = arith.constant 0 : index
    %64 = vector.load %arg14[%c0_47, %c0_48, %c0_49] : memref<2x160x48xbf16, #tpu.memory_space<vmem>>, vector<1x8x12xbf16>
    %65 = vector.shape_cast %64 : vector<1x8x12xbf16> to vector<8x12xbf16>
    %66 = vector.shape_cast %63 : vector<8x12xbf16> to vector<1x8x12xbf16>
    tpu.vector_store %arg14[%c0_47, %c0_48, %c0_49], %66 {strides = array<i32>} : memref<2x160x48xbf16, #tpu.memory_space<vmem>>, vector<1x8x12xbf16>,
    %67 = vector.extract_strided_slice %62 {offsets = [0, 12], sizes = [8, 12], strides = [1, 1]} : vector<8x48xbf16> to vector<8x12xbf16>
    %c0_50 = arith.constant 0 : index
    %c8_51 = arith.constant 8 : index
    %c0_52 = arith.constant 0 : index
    %68 = vector.load %arg14[%c0_50, %c8_51, %c0_52] : memref<2x160x48xbf16, #tpu.memory_space<vmem>>, vector<1x8x12xbf16>
    %69 = vector.shape_cast %68 : vector<1x8x12xbf16> to vector<8x12xbf16>
    %70 = vector.shape_cast %67 : vector<8x12xbf16> to vector<1x8x12xbf16>
    tpu.vector_store %arg14[%c0_50, %c8_51, %c0_52], %70 {strides = array<i32>} : memref<2x160x48xbf16, #tpu.memory_space<vmem>>, vector<1x8x12xbf16>,
    %71 = vector.extract_strided_slice %62 {offsets = [0, 24], sizes = [8, 12], strides = [1, 1]} : vector<8x48xbf16> to vector<8x12xbf16>
    %c0_53 = arith.constant 0 : index
    %c16 = arith.constant 16 : index
    %c0_54 = arith.constant 0 : index
    %72 = vector.load %arg14[%c0_53, %c16, %c0_54] : memref<2x160x48xbf16, #tpu.memory_space<vmem>>, vector<1x8x12xbf16>
    %73 = vector.shape_cast %72 : vector<1x8x12xbf16> to vector<8x12xbf16>
    %74 = vector.shape_cast %71 : vector<8x12xbf16> to vector<1x8x12xbf16>
    tpu.vector_store %arg14[%c0_53, %c16, %c0_54], %74 {strides = array<i32>} : memref<2x160x48xbf16, #tpu.memory_space<vmem>>, vector<1x8x12xbf16>,
    %75 = vector.extract_strided_slice %62 {offsets = [0, 36], sizes = [8, 12], strides = [1, 1]} : vector<8x48xbf16> to vector<8x12xbf16>
    %c0_55 = arith.constant 0 : index
    %c24 = arith.constant 24 : index
    %c0_56 = arith.constant 0 : index
    %76 = vector.load %arg14[%c0_55, %c24, %c0_56] : memref<2x160x48xbf16, #tpu.memory_space<vmem>>, vector<1x8x12xbf16>
    %77 = vector.shape_cast %76 : vector<1x8x12xbf16> to vector<8x12xbf16>
    %78 = vector.shape_cast %75 : vector<8x12xbf16> to vector<1x8x12xbf16>
    tpu.vector_store %arg14[%c0_55, %c24, %c0_56], %78 {strides = array<i32>} : memref<2x160x48xbf16, #tpu.memory_space<vmem>>, vector<1x8x12xbf16>,
    %c0_57 = arith.constant 0 : index
    %c0_58 = arith.constant 0 : index
    %c0_59 = arith.constant 0 : index
    %79 = vector.load %arg14[%c0_57, %c0_58, %c0_59] : memref<2x160x48xbf16, #tpu.memory_space<vmem>>, vector<1x32x12xbf16>
    %80 = vector.shape_cast %79 : vector<1x32x12xbf16> to vector<32x12xbf16>
    %cst_60 = arith.constant dense<0.000000e+00> : vector<16x12xf32>
    %81 = tpu.matmul %58, %80, %cst_60 {dimension_numbers = #tpu.dot_dimension_numbers<[1], [0], [0], [1], [0, 0, 1, 1], [], []>} : vector<16x32xbf16>, vector<32x12xbf16>, vector<16x12xf32> -> vector<16x12xf32>
    %82 = arith.truncf %57 : vector<8x24xf32> to vector<8x24xbf16>
    %cst_61 = arith.constant dense<0.000000e+00> : vector<8x48xf32>
    %83 = tpu.matmul %82, %59, %cst_61 {dimension_numbers = #tpu.dot_dimension_numbers<[1], [0], [0], [1], [0, 0, 1, 1], [], []>} : vector<8x24xbf16>, vector<24x48xbf16>, vector<8x48xf32> -> vector<8x48xf32>
    %84 = arith.truncf %83 : vector<8x48xf32> to vector<8x48xbf16>
    %85 = vector.extract_strided_slice %84 {offsets = [0, 0], sizes = [8, 12], strides = [1, 1]} : vector<8x48xbf16> to vector<8x12xbf16>
    %c1_62 = arith.constant 1 : index
    %c0_63 = arith.constant 0 : index
    %c0_64 = arith.constant 0 : index
    %86 = vector.load %arg14[%c1_62, %c0_63, %c0_64] : memref<2x160x48xbf16, #tpu.memory_space<vmem>>, vector<1x8x12xbf16>
    %87 = vector.shape_cast %86 : vector<1x8x12xbf16> to vector<8x12xbf16>
    %88 = vector.shape_cast %85 : vector<8x12xbf16> to vector<1x8x12xbf16>
    tpu.vector_store %arg14[%c1_62, %c0_63, %c0_64], %88 {strides = array<i32>} : memref<2x160x48xbf16, #tpu.memory_space<vmem>>, vector<1x8x12xbf16>,
    %89 = vector.extract_strided_slice %84 {offsets = [0, 12], sizes = [8, 12], strides = [1, 1]} : vector<8x48xbf16> to vector<8x12xbf16>
    %c1_65 = arith.constant 1 : index
    %c8_66 = arith.constant 8 : index
    %c0_67 = arith.constant 0 : index
    %90 = vector.load %arg14[%c1_65, %c8_66, %c0_67] : memref<2x160x48xbf16, #tpu.memory_space<vmem>>, vector<1x8x12xbf16>
    %91 = vector.shape_cast %90 : vector<1x8x12xbf16> to vector<8x12xbf16>
    %92 = vector.shape_cast %89 : vector<8x12xbf16> to vector<1x8x12xbf16>
    tpu.vector_store %arg14[%c1_65, %c8_66, %c0_67], %92 {strides = array<i32>} : memref<2x160x48xbf16, #tpu.memory_space<vmem>>, vector<1x8x12xbf16>,
    %93 = vector.extract_strided_slice %84 {offsets = [0, 24], sizes = [8, 12], strides = [1, 1]} : vector<8x48xbf16> to vector<8x12xbf16>
    %c1_68 = arith.constant 1 : index
    %c16_69 = arith.constant 16 : index
    %c0_70 = arith.constant 0 : index
    %94 = vector.load %arg14[%c1_68, %c16_69, %c0_70] : memref<2x160x48xbf16, #tpu.memory_space<vmem>>, vector<1x8x12xbf16>
    %95 = vector.shape_cast %94 : vector<1x8x12xbf16> to vector<8x12xbf16>
    %96 = vector.shape_cast %93 : vector<8x12xbf16> to vector<1x8x12xbf16>
    tpu.vector_store %arg14[%c1_68, %c16_69, %c0_70], %96 {strides = array<i32>} : memref<2x160x48xbf16, #tpu.memory_space<vmem>>, vector<1x8x12xbf16>,
    %97 = vector.extract_strided_slice %84 {offsets = [0, 36], sizes = [8, 12], strides = [1, 1]} : vector<8x48xbf16> to vector<8x12xbf16>
    %c1_71 = arith.constant 1 : index
    %c24_72 = arith.constant 24 : index
    %c0_73 = arith.constant 0 : index
    %98 = vector.load %arg14[%c1_71, %c24_72, %c0_73] : memref<2x160x48xbf16, #tpu.memory_space<vmem>>, vector<1x8x12xbf16>
    %99 = vector.shape_cast %98 : vector<1x8x12xbf16> to vector<8x12xbf16>
    %100 = vector.shape_cast %97 : vector<8x12xbf16> to vector<1x8x12xbf16>
    tpu.vector_store %arg14[%c1_71, %c24_72, %c0_73], %100 {strides = array<i32>} : memref<2x160x48xbf16, #tpu.memory_space<vmem>>, vector<1x8x12xbf16>,
    %c1_74 = arith.constant 1 : index
    %c0_75 = arith.constant 0 : index
    %c0_76 = arith.constant 0 : index
    %101 = vector.load %arg14[%c1_74, %c0_75, %c0_76] : memref<2x160x48xbf16, #tpu.memory_space<vmem>>, vector<1x32x12xbf16>
    %102 = vector.shape_cast %101 : vector<1x32x12xbf16> to vector<32x12xbf16>
    %cst_77 = arith.constant dense<0.000000e+00> : vector<16x12xf32>
    %103 = tpu.matmul %58, %102, %cst_77 {dimension_numbers = #tpu.dot_dimension_numbers<[1], [0], [0], [1], [0, 0, 1, 1], [], []>} : vector<16x32xbf16>, vector<32x12xbf16>, vector<16x12xf32> -> vector<16x12xf32>
    %cst_78 = arith.constant dense<0.000000e+00> : vector<16xf32>
    %104 = vector.multi_reduction <add>, %81, %cst_78 [1] : vector<16x12xf32> to vector<16xf32>
    %105 = vector.shape_cast %104 : vector<16xf32> to vector<16x1xf32>
    %cst_79 = arith.constant 0.000000e+00 : f32
    %106 = vector.broadcast %cst_79 : f32 to vector<16x1xf32>
    %107 = arith.addf %106, %105 : vector<16x1xf32>
    %cst_80 = arith.constant dense<0.000000e+00> : vector<16xf32>
    %108 = vector.multi_reduction <add>, %103, %cst_80 [1] : vector<16x12xf32> to vector<16xf32>
    %109 = vector.shape_cast %108 : vector<16xf32> to vector<16x1xf32>
    %110 = arith.addf %107, %109 : vector<16x1xf32>
    %cst_81 = arith.constant 2.400000e+01 : f32
    %111 = vector.broadcast %cst_81 : f32 to vector<16x1xf32>
    %112 = arith.divf %110, %111 : vector<16x1xf32>
    %113 = vector.broadcast %112 : vector<16x1xf32> to vector<16x12xf32>
    %114 = arith.subf %81, %113 : vector<16x12xf32>
    %115 = arith.mulf %114, %114 : vector<16x12xf32>
    %cst_82 = arith.constant dense<0.000000e+00> : vector<16xf32>
    %116 = vector.multi_reduction <add>, %115, %cst_82 [1] : vector<16x12xf32> to vector<16xf32>
    %117 = vector.shape_cast %116 : vector<16xf32> to vector<16x1xf32>
    %cst_83 = arith.constant 0.000000e+00 : f32
    %118 = vector.broadcast %cst_83 : f32 to vector<16x1xf32>
    %119 = arith.addf %118, %117 : vector<16x1xf32>
    %120 = vector.broadcast %112 : vector<16x1xf32> to vector<16x12xf32>
    %121 = arith.subf %103, %120 : vector<16x12xf32>
    %122 = arith.mulf %121, %121 : vector<16x12xf32>
    %cst_84 = arith.constant dense<0.000000e+00> : vector<16xf32>
    %123 = vector.multi_reduction <add>, %122, %cst_84 [1] : vector<16x12xf32> to vector<16xf32>
    %124 = vector.shape_cast %123 : vector<16xf32> to vector<16x1xf32>
    %125 = arith.addf %119, %124 : vector<16x1xf32>
    %cst_85 = arith.constant 2.400000e+01 : f32
    %126 = vector.broadcast %cst_85 : f32 to vector<16x1xf32>
    %127 = arith.divf %125, %126 : vector<16x1xf32>
    %cst_86 = arith.constant 9.99999974E-6 : f32
    %128 = vector.broadcast %cst_86 : f32 to vector<16x1xf32>
    %129 = arith.addf %127, %128 : vector<16x1xf32>
    %130 = math.rsqrt %129 : vector<16x1xf32>
    %131 = vector.broadcast %112 : vector<16x1xf32> to vector<16x12xf32>
    %132 = arith.subf %81, %131 : vector<16x12xf32>
    %133 = vector.broadcast %130 : vector<16x1xf32> to vector<16x12xf32>
    %134 = arith.mulf %132, %133 : vector<16x12xf32>
    %135 = vector.broadcast %112 : vector<16x1xf32> to vector<16x12xf32>
    %136 = arith.subf %103, %135 : vector<16x12xf32>
    %137 = vector.broadcast %130 : vector<16x1xf32> to vector<16x12xf32>
    %138 = arith.mulf %136, %137 : vector<16x12xf32>
    %cst_87 = arith.constant 0.000000e+00 : f32
    %139 = vector.broadcast %cst_87 : f32 to vector<16x12xf32>
    %140 = arith.cmpf ogt, %134, %139 : vector<16x12xf32>
    %cst_88 = arith.constant 2.000000e-01 : f32
    %141 = vector.broadcast %cst_88 : f32 to vector<16x12xf32>
    %142 = arith.mulf %141, %134 : vector<16x12xf32>
    %143 = arith.select %140, %134, %142 : vector<16x12xi1>, vector<16x12xf32>
    %cst_89 = arith.constant 0.000000e+00 : f32
    %144 = vector.broadcast %cst_89 : f32 to vector<16x12xf32>
    %145 = arith.cmpf ogt, %138, %144 : vector<16x12xf32>
    %cst_90 = arith.constant 2.000000e-01 : f32
    %146 = vector.broadcast %cst_90 : f32 to vector<16x12xf32>
    %147 = arith.mulf %146, %138 : vector<16x12xf32>
    %148 = arith.select %145, %138, %147 : vector<16x12xi1>, vector<16x12xf32>
    %c0_91 = arith.constant 0 : index
    %c0_92 = arith.constant 0 : index
    %149 = vector.load %arg3[%c0_91, %c0_92] : memref<32x80xbf16, #tpu.memory_space<vmem>>, vector<32x80xbf16>
    %c0_93 = arith.constant 0 : index
    %c0_94 = arith.constant 0 : index
    %150 = vector.load %arg9[%c0_93, %c0_94] : memref<12x20xbf16, #tpu.memory_space<vmem>>, vector<12x20xbf16>
    %151 = arith.truncf %143 : vector<16x12xf32> to vector<16x12xbf16>
    %cst_95 = arith.constant dense<0.000000e+00> : vector<16x20xf32>
    %152 = tpu.matmul %151, %150, %cst_95 {dimension_numbers = #tpu.dot_dimension_numbers<[1], [0], [0], [1], [0, 0, 1, 1], [], []>} : vector<16x12xbf16>, vector<12x20xbf16>, vector<16x20xf32> -> vector<16x20xf32>
    %153 = arith.truncf %152 : vector<16x20xf32> to vector<16x20xbf16>
    %154 = vector.extract_strided_slice %153 {offsets = [0, 0], sizes = [16, 4], strides = [1, 1]} : vector<16x20xbf16> to vector<16x4xbf16>
    %c0_96 = arith.constant 0 : index
    %c0_97 = arith.constant 0 : index
    %c0_98 = arith.constant 0 : index
    %155 = vector.load %arg14[%c0_96, %c0_97, %c0_98] : memref<2x160x48xbf16, #tpu.memory_space<vmem>>, vector<1x16x4xbf16>
    %156 = vector.shape_cast %155 : vector<1x16x4xbf16> to vector<16x4xbf16>
    %157 = vector.shape_cast %154 : vector<16x4xbf16> to vector<1x16x4xbf16>
    tpu.vector_store %arg14[%c0_96, %c0_97, %c0_98], %157 {strides = array<i32>} : memref<2x160x48xbf16, #tpu.memory_space<vmem>>, vector<1x16x4xbf16>,
    %158 = vector.extract_strided_slice %153 {offsets = [0, 4], sizes = [16, 4], strides = [1, 1]} : vector<16x20xbf16> to vector<16x4xbf16>
    %c0_99 = arith.constant 0 : index
    %c16_100 = arith.constant 16 : index
    %c0_101 = arith.constant 0 : index
    %159 = vector.load %arg14[%c0_99, %c16_100, %c0_101] : memref<2x160x48xbf16, #tpu.memory_space<vmem>>, vector<1x16x4xbf16>
    %160 = vector.shape_cast %159 : vector<1x16x4xbf16> to vector<16x4xbf16>
    %161 = vector.shape_cast %158 : vector<16x4xbf16> to vector<1x16x4xbf16>
    tpu.vector_store %arg14[%c0_99, %c16_100, %c0_101], %161 {strides = array<i32>} : memref<2x160x48xbf16, #tpu.memory_space<vmem>>, vector<1x16x4xbf16>,
    %162 = vector.extract_strided_slice %153 {offsets = [0, 8], sizes = [16, 4], strides = [1, 1]} : vector<16x20xbf16> to vector<16x4xbf16>
    %c0_102 = arith.constant 0 : index
    %c32 = arith.constant 32 : index
    %c0_103 = arith.constant 0 : index
    %163 = vector.load %arg14[%c0_102, %c32, %c0_103] : memref<2x160x48xbf16, #tpu.memory_space<vmem>>, vector<1x16x4xbf16>
    %164 = vector.shape_cast %163 : vector<1x16x4xbf16> to vector<16x4xbf16>
    %165 = vector.shape_cast %162 : vector<16x4xbf16> to vector<1x16x4xbf16>
    tpu.vector_store %arg14[%c0_102, %c32, %c0_103], %165 {strides = array<i32>} : memref<2x160x48xbf16, #tpu.memory_space<vmem>>, vector<1x16x4xbf16>,
    %166 = vector.extract_strided_slice %153 {offsets = [0, 12], sizes = [16, 4], strides = [1, 1]} : vector<16x20xbf16> to vector<16x4xbf16>
    %c0_104 = arith.constant 0 : index
    %c48 = arith.constant 48 : index
    %c0_105 = arith.constant 0 : index
    %167 = vector.load %arg14[%c0_104, %c48, %c0_105] : memref<2x160x48xbf16, #tpu.memory_space<vmem>>, vector<1x16x4xbf16>
    %168 = vector.shape_cast %167 : vector<1x16x4xbf16> to vector<16x4xbf16>
    %169 = vector.shape_cast %166 : vector<16x4xbf16> to vector<1x16x4xbf16>
    tpu.vector_store %arg14[%c0_104, %c48, %c0_105], %169 {strides = array<i32>} : memref<2x160x48xbf16, #tpu.memory_space<vmem>>, vector<1x16x4xbf16>,
    %170 = vector.extract_strided_slice %153 {offsets = [0, 16], sizes = [16, 4], strides = [1, 1]} : vector<16x20xbf16> to vector<16x4xbf16>
    %c0_106 = arith.constant 0 : index
    %c64 = arith.constant 64 : index
    %c0_107 = arith.constant 0 : index
    %171 = vector.load %arg14[%c0_106, %c64, %c0_107] : memref<2x160x48xbf16, #tpu.memory_space<vmem>>, vector<1x16x4xbf16>
    %172 = vector.shape_cast %171 : vector<1x16x4xbf16> to vector<16x4xbf16>
    %173 = vector.shape_cast %170 : vector<16x4xbf16> to vector<1x16x4xbf16>
    tpu.vector_store %arg14[%c0_106, %c64, %c0_107], %173 {strides = array<i32>} : memref<2x160x48xbf16, #tpu.memory_space<vmem>>, vector<1x16x4xbf16>,
    %c0_108 = arith.constant 0 : index
    %c0_109 = arith.constant 0 : index
    %c0_110 = arith.constant 0 : index
    %174 = vector.load %arg14[%c0_108, %c0_109, %c0_110] : memref<2x160x48xbf16, #tpu.memory_space<vmem>>, vector<1x80x4xbf16>
    %175 = vector.shape_cast %174 : vector<1x80x4xbf16> to vector<80x4xbf16>
    %cst_111 = arith.constant dense<0.000000e+00> : vector<32x4xf32>
    %176 = tpu.matmul %149, %175, %cst_111 {dimension_numbers = #tpu.dot_dimension_numbers<[1], [0], [0], [1], [0, 0, 1, 1], [], []>} : vector<32x80xbf16>, vector<80x4xbf16>, vector<32x4xf32> -> vector<32x4xf32>
    %177 = arith.truncf %148 : vector<16x12xf32> to vector<16x12xbf16>
    %cst_112 = arith.constant dense<0.000000e+00> : vector<16x20xf32>
    %178 = tpu.matmul %177, %150, %cst_112 {dimension_numbers = #tpu.dot_dimension_numbers<[1], [0], [0], [1], [0, 0, 1, 1], [], []>} : vector<16x12xbf16>, vector<12x20xbf16>, vector<16x20xf32> -> vector<16x20xf32>
    %179 = arith.truncf %178 : vector<16x20xf32> to vector<16x20xbf16>
    %180 = vector.extract_strided_slice %179 {offsets = [0, 0], sizes = [16, 4], strides = [1, 1]} : vector<16x20xbf16> to vector<16x4xbf16>
    %c1_113 = arith.constant 1 : index
    %c0_114 = arith.constant 0 : index
    %c0_115 = arith.constant 0 : index
    %181 = vector.load %arg14[%c1_113, %c0_114, %c0_115] : memref<2x160x48xbf16, #tpu.memory_space<vmem>>, vector<1x16x4xbf16>
    %182 = vector.shape_cast %181 : vector<1x16x4xbf16> to vector<16x4xbf16>
    %183 = vector.shape_cast %180 : vector<16x4xbf16> to vector<1x16x4xbf16>
    tpu.vector_store %arg14[%c1_113, %c0_114, %c0_115], %183 {strides = array<i32>} : memref<2x160x48xbf16, #tpu.memory_space<vmem>>, vector<1x16x4xbf16>,
    %184 = vector.extract_strided_slice %179 {offsets = [0, 4], sizes = [16, 4], strides = [1, 1]} : vector<16x20xbf16> to vector<16x4xbf16>
    %c1_116 = arith.constant 1 : index
    %c16_117 = arith.constant 16 : index
    %c0_118 = arith.constant 0 : index
    %185 = vector.load %arg14[%c1_116, %c16_117, %c0_118] : memref<2x160x48xbf16, #tpu.memory_space<vmem>>, vector<1x16x4xbf16>
    %186 = vector.shape_cast %185 : vector<1x16x4xbf16> to vector<16x4xbf16>
    %187 = vector.shape_cast %184 : vector<16x4xbf16> to vector<1x16x4xbf16>
    tpu.vector_store %arg14[%c1_116, %c16_117, %c0_118], %187 {strides = array<i32>} : memref<2x160x48xbf16, #tpu.memory_space<vmem>>, vector<1x16x4xbf16>,
    %188 = vector.extract_strided_slice %179 {offsets = [0, 8], sizes = [16, 4], strides = [1, 1]} : vector<16x20xbf16> to vector<16x4xbf16>
    %c1_119 = arith.constant 1 : index
    %c32_120 = arith.constant 32 : index
    %c0_121 = arith.constant 0 : index
    %189 = vector.load %arg14[%c1_119, %c32_120, %c0_121] : memref<2x160x48xbf16, #tpu.memory_space<vmem>>, vector<1x16x4xbf16>
    %190 = vector.shape_cast %189 : vector<1x16x4xbf16> to vector<16x4xbf16>
    %191 = vector.shape_cast %188 : vector<16x4xbf16> to vector<1x16x4xbf16>
    tpu.vector_store %arg14[%c1_119, %c32_120, %c0_121], %191 {strides = array<i32>} : memref<2x160x48xbf16, #tpu.memory_space<vmem>>, vector<1x16x4xbf16>,
    %192 = vector.extract_strided_slice %179 {offsets = [0, 12], sizes = [16, 4], strides = [1, 1]} : vector<16x20xbf16> to vector<16x4xbf16>
    %c1_122 = arith.constant 1 : index
    %c48_123 = arith.constant 48 : index
    %c0_124 = arith.constant 0 : index
    %193 = vector.load %arg14[%c1_122, %c48_123, %c0_124] : memref<2x160x48xbf16, #tpu.memory_space<vmem>>, vector<1x16x4xbf16>
    %194 = vector.shape_cast %193 : vector<1x16x4xbf16> to vector<16x4xbf16>
    %195 = vector.shape_cast %192 : vector<16x4xbf16> to vector<1x16x4xbf16>
    tpu.vector_store %arg14[%c1_122, %c48_123, %c0_124], %195 {strides = array<i32>} : memref<2x160x48xbf16, #tpu.memory_space<vmem>>, vector<1x16x4xbf16>,
    %196 = vector.extract_strided_slice %179 {offsets = [0, 16], sizes = [16, 4], strides = [1, 1]} : vector<16x20xbf16> to vector<16x4xbf16>
    %c1_125 = arith.constant 1 : index
    %c64_126 = arith.constant 64 : index
    %c0_127 = arith.constant 0 : index
    %197 = vector.load %arg14[%c1_125, %c64_126, %c0_127] : memref<2x160x48xbf16, #tpu.memory_space<vmem>>, vector<1x16x4xbf16>
    %198 = vector.shape_cast %197 : vector<1x16x4xbf16> to vector<16x4xbf16>
    %199 = vector.shape_cast %196 : vector<16x4xbf16> to vector<1x16x4xbf16>
    tpu.vector_store %arg14[%c1_125, %c64_126, %c0_127], %199 {strides = array<i32>} : memref<2x160x48xbf16, #tpu.memory_space<vmem>>, vector<1x16x4xbf16>,
    %c1_128 = arith.constant 1 : index
    %c0_129 = arith.constant 0 : index
    %c0_130 = arith.constant 0 : index
    %200 = vector.load %arg14[%c1_128, %c0_129, %c0_130] : memref<2x160x48xbf16, #tpu.memory_space<vmem>>, vector<1x80x4xbf16>
    %201 = vector.shape_cast %200 : vector<1x80x4xbf16> to vector<80x4xbf16>
    %cst_131 = arith.constant dense<0.000000e+00> : vector<32x4xf32>
    %202 = tpu.matmul %149, %201, %cst_131 {dimension_numbers = #tpu.dot_dimension_numbers<[1], [0], [0], [1], [0, 0, 1, 1], [], []>} : vector<32x80xbf16>, vector<80x4xbf16>, vector<32x4xf32> -> vector<32x4xf32>
    %cst_132 = arith.constant dense<0.000000e+00> : vector<32xf32>
    %203 = vector.multi_reduction <add>, %176, %cst_132 [1] : vector<32x4xf32> to vector<32xf32>
    %204 = vector.shape_cast %203 : vector<32xf32> to vector<32x1xf32>
    %cst_133 = arith.constant 0.000000e+00 : f32
    %205 = vector.broadcast %cst_133 : f32 to vector<32x1xf32>
    %206 = arith.addf %205, %204 : vector<32x1xf32>
    %cst_134 = arith.constant dense<0.000000e+00> : vector<32xf32>
    %207 = vector.multi_reduction <add>, %202, %cst_134 [1] : vector<32x4xf32> to vector<32xf32>
    %208 = vector.shape_cast %207 : vector<32xf32> to vector<32x1xf32>
    %209 = arith.addf %206, %208 : vector<32x1xf32>
    %cst_135 = arith.constant 8.000000e+00 : f32
    %210 = vector.broadcast %cst_135 : f32 to vector<32x1xf32>
    %211 = arith.divf %209, %210 : vector<32x1xf32>
    %212 = vector.broadcast %211 : vector<32x1xf32> to vector<32x4xf32>
    %213 = arith.subf %176, %212 : vector<32x4xf32>
    %214 = arith.mulf %213, %213 : vector<32x4xf32>
    %cst_136 = arith.constant dense<0.000000e+00> : vector<32xf32>
    %215 = vector.multi_reduction <add>, %214, %cst_136 [1] : vector<32x4xf32> to vector<32xf32>
    %216 = vector.shape_cast %215 : vector<32xf32> to vector<32x1xf32>
    %cst_137 = arith.constant 0.000000e+00 : f32
    %217 = vector.broadcast %cst_137 : f32 to vector<32x1xf32>
    %218 = arith.addf %217, %216 : vector<32x1xf32>
    %219 = vector.broadcast %211 : vector<32x1xf32> to vector<32x4xf32>
    %220 = arith.subf %202, %219 : vector<32x4xf32>
    %221 = arith.mulf %220, %220 : vector<32x4xf32>
    %cst_138 = arith.constant dense<0.000000e+00> : vector<32xf32>
    %222 = vector.multi_reduction <add>, %221, %cst_138 [1] : vector<32x4xf32> to vector<32xf32>
    %223 = vector.shape_cast %222 : vector<32xf32> to vector<32x1xf32>
    %224 = arith.addf %218, %223 : vector<32x1xf32>
    %cst_139 = arith.constant 8.000000e+00 : f32
    %225 = vector.broadcast %cst_139 : f32 to vector<32x1xf32>
    %226 = arith.divf %224, %225 : vector<32x1xf32>
    %cst_140 = arith.constant 9.99999974E-6 : f32
    %227 = vector.broadcast %cst_140 : f32 to vector<32x1xf32>
    %228 = arith.addf %226, %227 : vector<32x1xf32>
    %229 = math.rsqrt %228 : vector<32x1xf32>
    %230 = vector.broadcast %211 : vector<32x1xf32> to vector<32x4xf32>
    %231 = arith.subf %176, %230 : vector<32x4xf32>
    %232 = vector.broadcast %229 : vector<32x1xf32> to vector<32x4xf32>
    %233 = arith.mulf %231, %232 : vector<32x4xf32>
    %234 = vector.broadcast %211 : vector<32x1xf32> to vector<32x4xf32>
    %235 = arith.subf %202, %234 : vector<32x4xf32>
    %236 = vector.broadcast %229 : vector<32x1xf32> to vector<32x4xf32>
    %237 = arith.mulf %235, %236 : vector<32x4xf32>
    %cst_141 = arith.constant 0.000000e+00 : f32
    %238 = vector.broadcast %cst_141 : f32 to vector<32x4xf32>
    %239 = arith.cmpf ogt, %233, %238 : vector<32x4xf32>
    %cst_142 = arith.constant 2.000000e-01 : f32
    %240 = vector.broadcast %cst_142 : f32 to vector<32x4xf32>
    %241 = arith.mulf %240, %233 : vector<32x4xf32>
    %242 = arith.select %239, %233, %241 : vector<32x4xi1>, vector<32x4xf32>
    %cst_143 = arith.constant 0.000000e+00 : f32
    %243 = vector.broadcast %cst_143 : f32 to vector<32x4xf32>
    %244 = arith.cmpf ogt, %237, %243 : vector<32x4xf32>
    %cst_144 = arith.constant 2.000000e-01 : f32
    %245 = vector.broadcast %cst_144 : f32 to vector<32x4xf32>
    %246 = arith.mulf %245, %237 : vector<32x4xf32>
    %247 = arith.select %244, %237, %246 : vector<32x4xi1>, vector<32x4xf32>
    %c0_145 = arith.constant 0 : index
    %c0_146 = arith.constant 0 : index
    %248 = vector.load %arg4[%c0_145, %c0_146] : memref<16x160xbf16, #tpu.memory_space<vmem>>, vector<16x160xbf16>
    %c0_147 = arith.constant 0 : index
    %c0_148 = arith.constant 0 : index
    %249 = vector.load %arg10[%c0_147, %c0_148] : memref<4x60xbf16, #tpu.memory_space<vmem>>, vector<4x60xbf16>
    %250 = arith.truncf %242 : vector<32x4xf32> to vector<32x4xbf16>
    %cst_149 = arith.constant dense<0.000000e+00> : vector<32x60xf32>
    %251 = tpu.matmul %250, %249, %cst_149 {dimension_numbers = #tpu.dot_dimension_numbers<[1], [0], [0], [1], [0, 0, 1, 1], [], []>} : vector<32x4xbf16>, vector<4x60xbf16>, vector<32x60xf32> -> vector<32x60xf32>
    %252 = arith.truncf %251 : vector<32x60xf32> to vector<32x60xbf16>
    %253 = vector.extract_strided_slice %252 {offsets = [0, 0], sizes = [32, 12], strides = [1, 1]} : vector<32x60xbf16> to vector<32x12xbf16>
    %c0_150 = arith.constant 0 : index
    %c0_151 = arith.constant 0 : index
    %c0_152 = arith.constant 0 : index
    %254 = vector.load %arg14[%c0_150, %c0_151, %c0_152] : memref<2x160x48xbf16, #tpu.memory_space<vmem>>, vector<1x32x12xbf16>
    %255 = vector.shape_cast %254 : vector<1x32x12xbf16> to vector<32x12xbf16>
    %256 = vector.shape_cast %253 : vector<32x12xbf16> to vector<1x32x12xbf16>
    tpu.vector_store %arg14[%c0_150, %c0_151, %c0_152], %256 {strides = array<i32>} : memref<2x160x48xbf16, #tpu.memory_space<vmem>>, vector<1x32x12xbf16>,
    %257 = vector.extract_strided_slice %252 {offsets = [0, 12], sizes = [32, 12], strides = [1, 1]} : vector<32x60xbf16> to vector<32x12xbf16>
    %c0_153 = arith.constant 0 : index
    %c32_154 = arith.constant 32 : index
    %c0_155 = arith.constant 0 : index
    %258 = vector.load %arg14[%c0_153, %c32_154, %c0_155] : memref<2x160x48xbf16, #tpu.memory_space<vmem>>, vector<1x32x12xbf16>
    %259 = vector.shape_cast %258 : vector<1x32x12xbf16> to vector<32x12xbf16>
    %260 = vector.shape_cast %257 : vector<32x12xbf16> to vector<1x32x12xbf16>
    tpu.vector_store %arg14[%c0_153, %c32_154, %c0_155], %260 {strides = array<i32>} : memref<2x160x48xbf16, #tpu.memory_space<vmem>>, vector<1x32x12xbf16>,
    %261 = vector.extract_strided_slice %252 {offsets = [0, 24], sizes = [32, 12], strides = [1, 1]} : vector<32x60xbf16> to vector<32x12xbf16>
    %c0_156 = arith.constant 0 : index
    %c64_157 = arith.constant 64 : index
    %c0_158 = arith.constant 0 : index
    %262 = vector.load %arg14[%c0_156, %c64_157, %c0_158] : memref<2x160x48xbf16, #tpu.memory_space<vmem>>, vector<1x32x12xbf16>
    %263 = vector.shape_cast %262 : vector<1x32x12xbf16> to vector<32x12xbf16>
    %264 = vector.shape_cast %261 : vector<32x12xbf16> to vector<1x32x12xbf16>
    tpu.vector_store %arg14[%c0_156, %c64_157, %c0_158], %264 {strides = array<i32>} : memref<2x160x48xbf16, #tpu.memory_space<vmem>>, vector<1x32x12xbf16>,
    %265 = vector.extract_strided_slice %252 {offsets = [0, 36], sizes = [32, 12], strides = [1, 1]} : vector<32x60xbf16> to vector<32x12xbf16>
    %c0_159 = arith.constant 0 : index
    %c96 = arith.constant 96 : index
    %c0_160 = arith.constant 0 : index
    %266 = vector.load %arg14[%c0_159, %c96, %c0_160] : memref<2x160x48xbf16, #tpu.memory_space<vmem>>, vector<1x32x12xbf16>
    %267 = vector.shape_cast %266 : vector<1x32x12xbf16> to vector<32x12xbf16>
    %268 = vector.shape_cast %265 : vector<32x12xbf16> to vector<1x32x12xbf16>
    tpu.vector_store %arg14[%c0_159, %c96, %c0_160], %268 {strides = array<i32>} : memref<2x160x48xbf16, #tpu.memory_space<vmem>>, vector<1x32x12xbf16>,
    %269 = vector.extract_strided_slice %252 {offsets = [0, 48], sizes = [32, 12], strides = [1, 1]} : vector<32x60xbf16> to vector<32x12xbf16>
    %c0_161 = arith.constant 0 : index
    %c128 = arith.constant 128 : index
    %c0_162 = arith.constant 0 : index
    %270 = vector.load %arg14[%c0_161, %c128, %c0_162] : memref<2x160x48xbf16, #tpu.memory_space<vmem>>, vector<1x32x12xbf16>
    %271 = vector.shape_cast %270 : vector<1x32x12xbf16> to vector<32x12xbf16>
    %272 = vector.shape_cast %269 : vector<32x12xbf16> to vector<1x32x12xbf16>
    tpu.vector_store %arg14[%c0_161, %c128, %c0_162], %272 {strides = array<i32>} : memref<2x160x48xbf16, #tpu.memory_space<vmem>>, vector<1x32x12xbf16>,
    %c0_163 = arith.constant 0 : index
    %c0_164 = arith.constant 0 : index
    %c0_165 = arith.constant 0 : index
    %273 = vector.load %arg14[%c0_163, %c0_164, %c0_165] : memref<2x160x48xbf16, #tpu.memory_space<vmem>>, vector<1x160x12xbf16>
    %274 = vector.shape_cast %273 : vector<1x160x12xbf16> to vector<160x12xbf16>
    %cst_166 = arith.constant dense<0.000000e+00> : vector<16x12xf32>
    %275 = tpu.matmul %248, %274, %cst_166 {dimension_numbers = #tpu.dot_dimension_numbers<[1], [0], [0], [1], [0, 0, 1, 1], [], []>} : vector<16x160xbf16>, vector<160x12xbf16>, vector<16x12xf32> -> vector<16x12xf32>
    %276 = arith.truncf %247 : vector<32x4xf32> to vector<32x4xbf16>
    %cst_167 = arith.constant dense<0.000000e+00> : vector<32x60xf32>
    %277 = tpu.matmul %276, %249, %cst_167 {dimension_numbers = #tpu.dot_dimension_numbers<[1], [0], [0], [1], [0, 0, 1, 1], [], []>} : vector<32x4xbf16>, vector<4x60xbf16>, vector<32x60xf32> -> vector<32x60xf32>
    %278 = arith.truncf %277 : vector<32x60xf32> to vector<32x60xbf16>
    %279 = vector.extract_strided_slice %278 {offsets = [0, 0], sizes = [32, 12], strides = [1, 1]} : vector<32x60xbf16> to vector<32x12xbf16>
    %c1_168 = arith.constant 1 : index
    %c0_169 = arith.constant 0 : index
    %c0_170 = arith.constant 0 : index
    %280 = vector.load %arg14[%c1_168, %c0_169, %c0_170] : memref<2x160x48xbf16, #tpu.memory_space<vmem>>, vector<1x32x12xbf16>
    %281 = vector.shape_cast %280 : vector<1x32x12xbf16> to vector<32x12xbf16>
    %282 = vector.shape_cast %279 : vector<32x12xbf16> to vector<1x32x12xbf16>
    tpu.vector_store %arg14[%c1_168, %c0_169, %c0_170], %282 {strides = array<i32>} : memref<2x160x48xbf16, #tpu.memory_space<vmem>>, vector<1x32x12xbf16>,
    %283 = vector.extract_strided_slice %278 {offsets = [0, 12], sizes = [32, 12], strides = [1, 1]} : vector<32x60xbf16> to vector<32x12xbf16>
    %c1_171 = arith.constant 1 : index
    %c32_172 = arith.constant 32 : index
    %c0_173 = arith.constant 0 : index
    %284 = vector.load %arg14[%c1_171, %c32_172, %c0_173] : memref<2x160x48xbf16, #tpu.memory_space<vmem>>, vector<1x32x12xbf16>
    %285 = vector.shape_cast %284 : vector<1x32x12xbf16> to vector<32x12xbf16>
    %286 = vector.shape_cast %283 : vector<32x12xbf16> to vector<1x32x12xbf16>
    tpu.vector_store %arg14[%c1_171, %c32_172, %c0_173], %286 {strides = array<i32>} : memref<2x160x48xbf16, #tpu.memory_space<vmem>>, vector<1x32x12xbf16>,
    %287 = vector.extract_strided_slice %278 {offsets = [0, 24], sizes = [32, 12], strides = [1, 1]} : vector<32x60xbf16> to vector<32x12xbf16>
    %c1_174 = arith.constant 1 : index
    %c64_175 = arith.constant 64 : index
    %c0_176 = arith.constant 0 : index
    %288 = vector.load %arg14[%c1_174, %c64_175, %c0_176] : memref<2x160x48xbf16, #tpu.memory_space<vmem>>, vector<1x32x12xbf16>
    %289 = vector.shape_cast %288 : vector<1x32x12xbf16> to vector<32x12xbf16>
    %290 = vector.shape_cast %287 : vector<32x12xbf16> to vector<1x32x12xbf16>
    tpu.vector_store %arg14[%c1_174, %c64_175, %c0_176], %290 {strides = array<i32>} : memref<2x160x48xbf16, #tpu.memory_space<vmem>>, vector<1x32x12xbf16>,
    %291 = vector.extract_strided_slice %278 {offsets = [0, 36], sizes = [32, 12], strides = [1, 1]} : vector<32x60xbf16> to vector<32x12xbf16>
    %c1_177 = arith.constant 1 : index
    %c96_178 = arith.constant 96 : index
    %c0_179 = arith.constant 0 : index
    %292 = vector.load %arg14[%c1_177, %c96_178, %c0_179] : memref<2x160x48xbf16, #tpu.memory_space<vmem>>, vector<1x32x12xbf16>
    %293 = vector.shape_cast %292 : vector<1x32x12xbf16> to vector<32x12xbf16>
    %294 = vector.shape_cast %291 : vector<32x12xbf16> to vector<1x32x12xbf16>
    tpu.vector_store %arg14[%c1_177, %c96_178, %c0_179], %294 {strides = array<i32>} : memref<2x160x48xbf16, #tpu.memory_space<vmem>>, vector<1x32x12xbf16>,
    %295 = vector.extract_strided_slice %278 {offsets = [0, 48], sizes = [32, 12], strides = [1, 1]} : vector<32x60xbf16> to vector<32x12xbf16>
    %c1_180 = arith.constant 1 : index
    %c128_181 = arith.constant 128 : index
    %c0_182 = arith.constant 0 : index
    %296 = vector.load %arg14[%c1_180, %c128_181, %c0_182] : memref<2x160x48xbf16, #tpu.memory_space<vmem>>, vector<1x32x12xbf16>
    %297 = vector.shape_cast %296 : vector<1x32x12xbf16> to vector<32x12xbf16>
    %298 = vector.shape_cast %295 : vector<32x12xbf16> to vector<1x32x12xbf16>
    tpu.vector_store %arg14[%c1_180, %c128_181, %c0_182], %298 {strides = array<i32>} : memref<2x160x48xbf16, #tpu.memory_space<vmem>>, vector<1x32x12xbf16>,
    %c1_183 = arith.constant 1 : index
    %c0_184 = arith.constant 0 : index
    %c0_185 = arith.constant 0 : index
    %299 = vector.load %arg14[%c1_183, %c0_184, %c0_185] : memref<2x160x48xbf16, #tpu.memory_space<vmem>>, vector<1x160x12xbf16>
    %300 = vector.shape_cast %299 : vector<1x160x12xbf16> to vector<160x12xbf16>
    %cst_186 = arith.constant dense<0.000000e+00> : vector<16x12xf32>
    %301 = tpu.matmul %248, %300, %cst_186 {dimension_numbers = #tpu.dot_dimension_numbers<[1], [0], [0], [1], [0, 0, 1, 1], [], []>} : vector<16x160xbf16>, vector<160x12xbf16>, vector<16x12xf32> -> vector<16x12xf32>
    %cst_187 = arith.constant dense<0.000000e+00> : vector<16xf32>
    %302 = vector.multi_reduction <add>, %275, %cst_187 [1] : vector<16x12xf32> to vector<16xf32>
    %303 = vector.shape_cast %302 : vector<16xf32> to vector<16x1xf32>
    %cst_188 = arith.constant 0.000000e+00 : f32
    %304 = vector.broadcast %cst_188 : f32 to vector<16x1xf32>
    %305 = arith.addf %304, %303 : vector<16x1xf32>
    %cst_189 = arith.constant dense<0.000000e+00> : vector<16xf32>
    %306 = vector.multi_reduction <add>, %301, %cst_189 [1] : vector<16x12xf32> to vector<16xf32>
    %307 = vector.shape_cast %306 : vector<16xf32> to vector<16x1xf32>
    %308 = arith.addf %305, %307 : vector<16x1xf32>
    %cst_190 = arith.constant 2.400000e+01 : f32
    %309 = vector.broadcast %cst_190 : f32 to vector<16x1xf32>
    %310 = arith.divf %308, %309 : vector<16x1xf32>
    %311 = vector.broadcast %310 : vector<16x1xf32> to vector<16x12xf32>
    %312 = arith.subf %275, %311 : vector<16x12xf32>
    %313 = arith.mulf %312, %312 : vector<16x12xf32>
    %cst_191 = arith.constant dense<0.000000e+00> : vector<16xf32>
    %314 = vector.multi_reduction <add>, %313, %cst_191 [1] : vector<16x12xf32> to vector<16xf32>
    %315 = vector.shape_cast %314 : vector<16xf32> to vector<16x1xf32>
    %cst_192 = arith.constant 0.000000e+00 : f32
    %316 = vector.broadcast %cst_192 : f32 to vector<16x1xf32>
    %317 = arith.addf %316, %315 : vector<16x1xf32>
    %318 = vector.broadcast %310 : vector<16x1xf32> to vector<16x12xf32>
    %319 = arith.subf %301, %318 : vector<16x12xf32>
    %320 = arith.mulf %319, %319 : vector<16x12xf32>
    %cst_193 = arith.constant dense<0.000000e+00> : vector<16xf32>
    %321 = vector.multi_reduction <add>, %320, %cst_193 [1] : vector<16x12xf32> to vector<16xf32>
    %322 = vector.shape_cast %321 : vector<16xf32> to vector<16x1xf32>
    %323 = arith.addf %317, %322 : vector<16x1xf32>
    %cst_194 = arith.constant 2.400000e+01 : f32
    %324 = vector.broadcast %cst_194 : f32 to vector<16x1xf32>
    %325 = arith.divf %323, %324 : vector<16x1xf32>
    %cst_195 = arith.constant 9.99999974E-6 : f32
    %326 = vector.broadcast %cst_195 : f32 to vector<16x1xf32>
    %327 = arith.addf %325, %326 : vector<16x1xf32>
    %328 = math.rsqrt %327 : vector<16x1xf32>
    %329 = vector.broadcast %310 : vector<16x1xf32> to vector<16x12xf32>
    %330 = arith.subf %275, %329 : vector<16x12xf32>
    %331 = vector.broadcast %328 : vector<16x1xf32> to vector<16x12xf32>
    %332 = arith.mulf %330, %331 : vector<16x12xf32>
    %333 = vector.broadcast %310 : vector<16x1xf32> to vector<16x12xf32>
    %334 = arith.subf %301, %333 : vector<16x12xf32>
    %335 = vector.broadcast %328 : vector<16x1xf32> to vector<16x12xf32>
    %336 = arith.mulf %334, %335 : vector<16x12xf32>
    %cst_196 = arith.constant 0.000000e+00 : f32
    %337 = vector.broadcast %cst_196 : f32 to vector<16x12xf32>
    %338 = arith.maximumf %332, %337 : vector<16x12xf32>
    %cst_197 = arith.constant 0.000000e+00 : f32
    %339 = vector.broadcast %cst_197 : f32 to vector<16x12xf32>
    %340 = arith.maximumf %336, %339 : vector<16x12xf32>
    %c0_198 = arith.constant 0 : index
    %c0_199 = arith.constant 0 : index
    %341 = vector.load %arg5[%c0_198, %c0_199] : memref<8x64xbf16, #tpu.memory_space<vmem>>, vector<8x64xbf16>
    %c0_200 = arith.constant 0 : index
    %c0_201 = arith.constant 0 : index
    %342 = vector.load %arg11[%c0_200, %c0_201] : memref<12x96xbf16, #tpu.memory_space<vmem>>, vector<12x96xbf16>
    %343 = arith.truncf %338 : vector<16x12xf32> to vector<16x12xbf16>
    %cst_202 = arith.constant dense<0.000000e+00> : vector<16x96xf32>
    %344 = tpu.matmul %343, %342, %cst_202 {dimension_numbers = #tpu.dot_dimension_numbers<[1], [0], [0], [1], [0, 0, 1, 1], [], []>} : vector<16x12xbf16>, vector<12x96xbf16>, vector<16x96xf32> -> vector<16x96xf32>
    %345 = arith.truncf %344 : vector<16x96xf32> to vector<16x96xbf16>
    %346 = vector.extract_strided_slice %345 {offsets = [0, 0], sizes = [16, 24], strides = [1, 1]} : vector<16x96xbf16> to vector<16x24xbf16>
    %c0_203 = arith.constant 0 : index
    %c0_204 = arith.constant 0 : index
    %c0_205 = arith.constant 0 : index
    %347 = vector.load %arg14[%c0_203, %c0_204, %c0_205] : memref<2x160x48xbf16, #tpu.memory_space<vmem>>, vector<1x16x24xbf16>
    %348 = vector.shape_cast %347 : vector<1x16x24xbf16> to vector<16x24xbf16>
    %349 = vector.shape_cast %346 : vector<16x24xbf16> to vector<1x16x24xbf16>
    tpu.vector_store %arg14[%c0_203, %c0_204, %c0_205], %349 {strides = array<i32>} : memref<2x160x48xbf16, #tpu.memory_space<vmem>>, vector<1x16x24xbf16>,
    %350 = vector.extract_strided_slice %345 {offsets = [0, 24], sizes = [16, 24], strides = [1, 1]} : vector<16x96xbf16> to vector<16x24xbf16>
    %c0_206 = arith.constant 0 : index
    %c16_207 = arith.constant 16 : index
    %c0_208 = arith.constant 0 : index
    %351 = vector.load %arg14[%c0_206, %c16_207, %c0_208] : memref<2x160x48xbf16, #tpu.memory_space<vmem>>, vector<1x16x24xbf16>
    %352 = vector.shape_cast %351 : vector<1x16x24xbf16> to vector<16x24xbf16>
    %353 = vector.shape_cast %350 : vector<16x24xbf16> to vector<1x16x24xbf16>
    tpu.vector_store %arg14[%c0_206, %c16_207, %c0_208], %353 {strides = array<i32>} : memref<2x160x48xbf16, #tpu.memory_space<vmem>>, vector<1x16x24xbf16>,
    %354 = vector.extract_strided_slice %345 {offsets = [0, 48], sizes = [16, 24], strides = [1, 1]} : vector<16x96xbf16> to vector<16x24xbf16>
    %c0_209 = arith.constant 0 : index
    %c32_210 = arith.constant 32 : index
    %c0_211 = arith.constant 0 : index
    %355 = vector.load %arg14[%c0_209, %c32_210, %c0_211] : memref<2x160x48xbf16, #tpu.memory_space<vmem>>, vector<1x16x24xbf16>
    %356 = vector.shape_cast %355 : vector<1x16x24xbf16> to vector<16x24xbf16>
    %357 = vector.shape_cast %354 : vector<16x24xbf16> to vector<1x16x24xbf16>
    tpu.vector_store %arg14[%c0_209, %c32_210, %c0_211], %357 {strides = array<i32>} : memref<2x160x48xbf16, #tpu.memory_space<vmem>>, vector<1x16x24xbf16>,
    %358 = vector.extract_strided_slice %345 {offsets = [0, 72], sizes = [16, 24], strides = [1, 1]} : vector<16x96xbf16> to vector<16x24xbf16>
    %c0_212 = arith.constant 0 : index
    %c48_213 = arith.constant 48 : index
    %c0_214 = arith.constant 0 : index
    %359 = vector.load %arg14[%c0_212, %c48_213, %c0_214] : memref<2x160x48xbf16, #tpu.memory_space<vmem>>, vector<1x16x24xbf16>
    %360 = vector.shape_cast %359 : vector<1x16x24xbf16> to vector<16x24xbf16>
    %361 = vector.shape_cast %358 : vector<16x24xbf16> to vector<1x16x24xbf16>
    tpu.vector_store %arg14[%c0_212, %c48_213, %c0_214], %361 {strides = array<i32>} : memref<2x160x48xbf16, #tpu.memory_space<vmem>>, vector<1x16x24xbf16>,
    %c0_215 = arith.constant 0 : index
    %c0_216 = arith.constant 0 : index
    %c0_217 = arith.constant 0 : index
    %362 = vector.load %arg14[%c0_215, %c0_216, %c0_217] : memref<2x160x48xbf16, #tpu.memory_space<vmem>>, vector<1x64x24xbf16>
    %363 = vector.shape_cast %362 : vector<1x64x24xbf16> to vector<64x24xbf16>
    %cst_218 = arith.constant dense<0.000000e+00> : vector<8x24xf32>
    %364 = tpu.matmul %341, %363, %cst_218 {dimension_numbers = #tpu.dot_dimension_numbers<[1], [0], [0], [1], [0, 0, 1, 1], [], []>} : vector<8x64xbf16>, vector<64x24xbf16>, vector<8x24xf32> -> vector<8x24xf32>
    %365 = arith.truncf %340 : vector<16x12xf32> to vector<16x12xbf16>
    %cst_219 = arith.constant dense<0.000000e+00> : vector<16x96xf32>
    %366 = tpu.matmul %365, %342, %cst_219 {dimension_numbers = #tpu.dot_dimension_numbers<[1], [0], [0], [1], [0, 0, 1, 1], [], []>} : vector<16x12xbf16>, vector<12x96xbf16>, vector<16x96xf32> -> vector<16x96xf32>
    %367 = arith.truncf %366 : vector<16x96xf32> to vector<16x96xbf16>
    %368 = vector.extract_strided_slice %367 {offsets = [0, 0], sizes = [16, 24], strides = [1, 1]} : vector<16x96xbf16> to vector<16x24xbf16>
    %c1_220 = arith.constant 1 : index
    %c0_221 = arith.constant 0 : index
    %c0_222 = arith.constant 0 : index
    %369 = vector.load %arg14[%c1_220, %c0_221, %c0_222] : memref<2x160x48xbf16, #tpu.memory_space<vmem>>, vector<1x16x24xbf16>
    %370 = vector.shape_cast %369 : vector<1x16x24xbf16> to vector<16x24xbf16>
    %371 = vector.shape_cast %368 : vector<16x24xbf16> to vector<1x16x24xbf16>
    tpu.vector_store %arg14[%c1_220, %c0_221, %c0_222], %371 {strides = array<i32>} : memref<2x160x48xbf16, #tpu.memory_space<vmem>>, vector<1x16x24xbf16>,
    %372 = vector.extract_strided_slice %367 {offsets = [0, 24], sizes = [16, 24], strides = [1, 1]} : vector<16x96xbf16> to vector<16x24xbf16>
    %c1_223 = arith.constant 1 : index
    %c16_224 = arith.constant 16 : index
    %c0_225 = arith.constant 0 : index
    %373 = vector.load %arg14[%c1_223, %c16_224, %c0_225] : memref<2x160x48xbf16, #tpu.memory_space<vmem>>, vector<1x16x24xbf16>
    %374 = vector.shape_cast %373 : vector<1x16x24xbf16> to vector<16x24xbf16>
    %375 = vector.shape_cast %372 : vector<16x24xbf16> to vector<1x16x24xbf16>
    tpu.vector_store %arg14[%c1_223, %c16_224, %c0_225], %375 {strides = array<i32>} : memref<2x160x48xbf16, #tpu.memory_space<vmem>>, vector<1x16x24xbf16>,
    %376 = vector.extract_strided_slice %367 {offsets = [0, 48], sizes = [16, 24], strides = [1, 1]} : vector<16x96xbf16> to vector<16x24xbf16>
    %c1_226 = arith.constant 1 : index
    %c32_227 = arith.constant 32 : index
    %c0_228 = arith.constant 0 : index
    %377 = vector.load %arg14[%c1_226, %c32_227, %c0_228] : memref<2x160x48xbf16, #tpu.memory_space<vmem>>, vector<1x16x24xbf16>
    %378 = vector.shape_cast %377 : vector<1x16x24xbf16> to vector<16x24xbf16>
    %379 = vector.shape_cast %376 : vector<16x24xbf16> to vector<1x16x24xbf16>
    tpu.vector_store %arg14[%c1_226, %c32_227, %c0_228], %379 {strides = array<i32>} : memref<2x160x48xbf16, #tpu.memory_space<vmem>>, vector<1x16x24xbf16>,
    %380 = vector.extract_strided_slice %367 {offsets = [0, 72], sizes = [16, 24], strides = [1, 1]} : vector<16x96xbf16> to vector<16x24xbf16>
    %c1_229 = arith.constant 1 : index
    %c48_230 = arith.constant 48 : index
    %c0_231 = arith.constant 0 : index
    %381 = vector.load %arg14[%c1_229, %c48_230, %c0_231] : memref<2x160x48xbf16, #tpu.memory_space<vmem>>, vector<1x16x24xbf16>
    %382 = vector.shape_cast %381 : vector<1x16x24xbf16> to vector<16x24xbf16>
    %383 = vector.shape_cast %380 : vector<16x24xbf16> to vector<1x16x24xbf16>
    tpu.vector_store %arg14[%c1_229, %c48_230, %c0_231], %383 {strides = array<i32>} : memref<2x160x48xbf16, #tpu.memory_space<vmem>>, vector<1x16x24xbf16>,
    %c1_232 = arith.constant 1 : index
    %c0_233 = arith.constant 0 : index
    %c0_234 = arith.constant 0 : index
    %384 = vector.load %arg14[%c1_232, %c0_233, %c0_234] : memref<2x160x48xbf16, #tpu.memory_space<vmem>>, vector<1x64x24xbf16>
    %385 = vector.shape_cast %384 : vector<1x64x24xbf16> to vector<64x24xbf16>
    %cst_235 = arith.constant dense<0.000000e+00> : vector<8x24xf32>
    %386 = tpu.matmul %341, %385, %cst_235 {dimension_numbers = #tpu.dot_dimension_numbers<[1], [0], [0], [1], [0, 0, 1, 1], [], []>} : vector<8x64xbf16>, vector<64x24xbf16>, vector<8x24xf32> -> vector<8x24xf32>
    %cst_236 = arith.constant dense<0.000000e+00> : vector<8xf32>
    %387 = vector.multi_reduction <add>, %364, %cst_236 [1] : vector<8x24xf32> to vector<8xf32>
    %388 = vector.shape_cast %387 : vector<8xf32> to vector<8x1xf32>
    %cst_237 = arith.constant 0.000000e+00 : f32
    %389 = vector.broadcast %cst_237 : f32 to vector<8x1xf32>
    %390 = arith.addf %389, %388 : vector<8x1xf32>
    %cst_238 = arith.constant dense<0.000000e+00> : vector<8xf32>
    %391 = vector.multi_reduction <add>, %386, %cst_238 [1] : vector<8x24xf32> to vector<8xf32>
    %392 = vector.shape_cast %391 : vector<8xf32> to vector<8x1xf32>
    %393 = arith.addf %390, %392 : vector<8x1xf32>
    %cst_239 = arith.constant 4.800000e+01 : f32
    %394 = vector.broadcast %cst_239 : f32 to vector<8x1xf32>
    %395 = arith.divf %393, %394 : vector<8x1xf32>
    %396 = vector.broadcast %395 : vector<8x1xf32> to vector<8x24xf32>
    %397 = arith.subf %364, %396 : vector<8x24xf32>
    %398 = arith.mulf %397, %397 : vector<8x24xf32>
    %cst_240 = arith.constant dense<0.000000e+00> : vector<8xf32>
    %399 = vector.multi_reduction <add>, %398, %cst_240 [1] : vector<8x24xf32> to vector<8xf32>
    %400 = vector.shape_cast %399 : vector<8xf32> to vector<8x1xf32>
    %cst_241 = arith.constant 0.000000e+00 : f32
    %401 = vector.broadcast %cst_241 : f32 to vector<8x1xf32>
    %402 = arith.addf %401, %400 : vector<8x1xf32>
    %403 = vector.broadcast %395 : vector<8x1xf32> to vector<8x24xf32>
    %404 = arith.subf %386, %403 : vector<8x24xf32>
    %405 = arith.mulf %404, %404 : vector<8x24xf32>
    %cst_242 = arith.constant dense<0.000000e+00> : vector<8xf32>
    %406 = vector.multi_reduction <add>, %405, %cst_242 [1] : vector<8x24xf32> to vector<8xf32>
    %407 = vector.shape_cast %406 : vector<8xf32> to vector<8x1xf32>
    %408 = arith.addf %402, %407 : vector<8x1xf32>
    %cst_243 = arith.constant 4.800000e+01 : f32
    %409 = vector.broadcast %cst_243 : f32 to vector<8x1xf32>
    %410 = arith.divf %408, %409 : vector<8x1xf32>
    %cst_244 = arith.constant 9.99999974E-6 : f32
    %411 = vector.broadcast %cst_244 : f32 to vector<8x1xf32>
    %412 = arith.addf %410, %411 : vector<8x1xf32>
    %413 = math.rsqrt %412 : vector<8x1xf32>
    %414 = vector.broadcast %395 : vector<8x1xf32> to vector<8x24xf32>
    %415 = arith.subf %364, %414 : vector<8x24xf32>
    %416 = vector.broadcast %413 : vector<8x1xf32> to vector<8x24xf32>
    %417 = arith.mulf %415, %416 : vector<8x24xf32>
    %418 = vector.broadcast %395 : vector<8x1xf32> to vector<8x24xf32>
    %419 = arith.subf %386, %418 : vector<8x24xf32>
    %420 = vector.broadcast %413 : vector<8x1xf32> to vector<8x24xf32>
    %421 = arith.mulf %419, %420 : vector<8x24xf32>
    %cst_245 = arith.constant 0.000000e+00 : f32
    %422 = vector.broadcast %cst_245 : f32 to vector<8x24xf32>
    %423 = arith.maximumf %417, %422 : vector<8x24xf32>
    %cst_246 = arith.constant 0.000000e+00 : f32
    %424 = vector.broadcast %cst_246 : f32 to vector<8x24xf32>
    %425 = arith.maximumf %421, %424 : vector<8x24xf32>
    %c0_247 = arith.constant 0 : index
    %c0_248 = arith.constant 0 : index
    %426 = vector.load %arg6[%c0_247, %c0_248] : memref<4x32xbf16, #tpu.memory_space<vmem>>, vector<4x32xbf16>
    %c0_249 = arith.constant 0 : index
    %c0_250 = arith.constant 0 : index
    %427 = vector.load %arg12[%c0_249, %c0_250] : memref<24x192xbf16, #tpu.memory_space<vmem>>, vector<24x192xbf16>
    %428 = arith.truncf %423 : vector<8x24xf32> to vector<8x24xbf16>
    %cst_251 = arith.constant dense<0.000000e+00> : vector<8x192xf32>
    %429 = tpu.matmul %428, %427, %cst_251 {dimension_numbers = #tpu.dot_dimension_numbers<[1], [0], [0], [1], [0, 0, 1, 1], [], []>} : vector<8x24xbf16>, vector<24x192xbf16>, vector<8x192xf32> -> vector<8x192xf32>
    %430 = arith.truncf %429 : vector<8x192xf32> to vector<8x192xbf16>
    %431 = vector.extract_strided_slice %430 {offsets = [0, 0], sizes = [8, 48], strides = [1, 1]} : vector<8x192xbf16> to vector<8x48xbf16>
    %c0_252 = arith.constant 0 : index
    %c0_253 = arith.constant 0 : index
    %c0_254 = arith.constant 0 : index
    %432 = vector.load %arg14[%c0_252, %c0_253, %c0_254] : memref<2x160x48xbf16, #tpu.memory_space<vmem>>, vector<1x8x48xbf16>
    %433 = vector.shape_cast %432 : vector<1x8x48xbf16> to vector<8x48xbf16>
    %434 = vector.shape_cast %431 : vector<8x48xbf16> to vector<1x8x48xbf16>
    tpu.vector_store %arg14[%c0_252, %c0_253, %c0_254], %434 {strides = array<i32>} : memref<2x160x48xbf16, #tpu.memory_space<vmem>>, vector<1x8x48xbf16>,
    %435 = vector.extract_strided_slice %430 {offsets = [0, 48], sizes = [8, 48], strides = [1, 1]} : vector<8x192xbf16> to vector<8x48xbf16>
    %c0_255 = arith.constant 0 : index
    %c8_256 = arith.constant 8 : index
    %c0_257 = arith.constant 0 : index
    %436 = vector.load %arg14[%c0_255, %c8_256, %c0_257] : memref<2x160x48xbf16, #tpu.memory_space<vmem>>, vector<1x8x48xbf16>
    %437 = vector.shape_cast %436 : vector<1x8x48xbf16> to vector<8x48xbf16>
    %438 = vector.shape_cast %435 : vector<8x48xbf16> to vector<1x8x48xbf16>
    tpu.vector_store %arg14[%c0_255, %c8_256, %c0_257], %438 {strides = array<i32>} : memref<2x160x48xbf16, #tpu.memory_space<vmem>>, vector<1x8x48xbf16>,
    %439 = vector.extract_strided_slice %430 {offsets = [0, 96], sizes = [8, 48], strides = [1, 1]} : vector<8x192xbf16> to vector<8x48xbf16>
    %c0_258 = arith.constant 0 : index
    %c16_259 = arith.constant 16 : index
    %c0_260 = arith.constant 0 : index
    %440 = vector.load %arg14[%c0_258, %c16_259, %c0_260] : memref<2x160x48xbf16, #tpu.memory_space<vmem>>, vector<1x8x48xbf16>
    %441 = vector.shape_cast %440 : vector<1x8x48xbf16> to vector<8x48xbf16>
    %442 = vector.shape_cast %439 : vector<8x48xbf16> to vector<1x8x48xbf16>
    tpu.vector_store %arg14[%c0_258, %c16_259, %c0_260], %442 {strides = array<i32>} : memref<2x160x48xbf16, #tpu.memory_space<vmem>>, vector<1x8x48xbf16>,
    %443 = vector.extract_strided_slice %430 {offsets = [0, 144], sizes = [8, 48], strides = [1, 1]} : vector<8x192xbf16> to vector<8x48xbf16>
    %c0_261 = arith.constant 0 : index
    %c24_262 = arith.constant 24 : index
    %c0_263 = arith.constant 0 : index
    %444 = vector.load %arg14[%c0_261, %c24_262, %c0_263] : memref<2x160x48xbf16, #tpu.memory_space<vmem>>, vector<1x8x48xbf16>
    %445 = vector.shape_cast %444 : vector<1x8x48xbf16> to vector<8x48xbf16>
    %446 = vector.shape_cast %443 : vector<8x48xbf16> to vector<1x8x48xbf16>
    tpu.vector_store %arg14[%c0_261, %c24_262, %c0_263], %446 {strides = array<i32>} : memref<2x160x48xbf16, #tpu.memory_space<vmem>>, vector<1x8x48xbf16>,
    %c0_264 = arith.constant 0 : index
    %c0_265 = arith.constant 0 : index
    %c0_266 = arith.constant 0 : index
    %447 = vector.load %arg14[%c0_264, %c0_265, %c0_266] : memref<2x160x48xbf16, #tpu.memory_space<vmem>>, vector<1x32x48xbf16>
    %448 = vector.shape_cast %447 : vector<1x32x48xbf16> to vector<32x48xbf16>
    %cst_267 = arith.constant dense<0.000000e+00> : vector<4x48xf32>
    %449 = tpu.matmul %426, %448, %cst_267 {dimension_numbers = #tpu.dot_dimension_numbers<[1], [0], [0], [1], [0, 0, 1, 1], [], []>} : vector<4x32xbf16>, vector<32x48xbf16>, vector<4x48xf32> -> vector<4x48xf32>
    %450 = arith.truncf %425 : vector<8x24xf32> to vector<8x24xbf16>
    %cst_268 = arith.constant dense<0.000000e+00> : vector<8x192xf32>
    %451 = tpu.matmul %450, %427, %cst_268 {dimension_numbers = #tpu.dot_dimension_numbers<[1], [0], [0], [1], [0, 0, 1, 1], [], []>} : vector<8x24xbf16>, vector<24x192xbf16>, vector<8x192xf32> -> vector<8x192xf32>
    %452 = arith.truncf %451 : vector<8x192xf32> to vector<8x192xbf16>
    %453 = vector.extract_strided_slice %452 {offsets = [0, 0], sizes = [8, 48], strides = [1, 1]} : vector<8x192xbf16> to vector<8x48xbf16>
    %c1_269 = arith.constant 1 : index
    %c0_270 = arith.constant 0 : index
    %c0_271 = arith.constant 0 : index
    %454 = vector.load %arg14[%c1_269, %c0_270, %c0_271] : memref<2x160x48xbf16, #tpu.memory_space<vmem>>, vector<1x8x48xbf16>
    %455 = vector.shape_cast %454 : vector<1x8x48xbf16> to vector<8x48xbf16>
    %456 = vector.shape_cast %453 : vector<8x48xbf16> to vector<1x8x48xbf16>
    tpu.vector_store %arg14[%c1_269, %c0_270, %c0_271], %456 {strides = array<i32>} : memref<2x160x48xbf16, #tpu.memory_space<vmem>>, vector<1x8x48xbf16>,
    %457 = vector.extract_strided_slice %452 {offsets = [0, 48], sizes = [8, 48], strides = [1, 1]} : vector<8x192xbf16> to vector<8x48xbf16>
    %c1_272 = arith.constant 1 : index
    %c8_273 = arith.constant 8 : index
    %c0_274 = arith.constant 0 : index
    %458 = vector.load %arg14[%c1_272, %c8_273, %c0_274] : memref<2x160x48xbf16, #tpu.memory_space<vmem>>, vector<1x8x48xbf16>
    %459 = vector.shape_cast %458 : vector<1x8x48xbf16> to vector<8x48xbf16>
    %460 = vector.shape_cast %457 : vector<8x48xbf16> to vector<1x8x48xbf16>
    tpu.vector_store %arg14[%c1_272, %c8_273, %c0_274], %460 {strides = array<i32>} : memref<2x160x48xbf16, #tpu.memory_space<vmem>>, vector<1x8x48xbf16>,
    %461 = vector.extract_strided_slice %452 {offsets = [0, 96], sizes = [8, 48], strides = [1, 1]} : vector<8x192xbf16> to vector<8x48xbf16>
    %c1_275 = arith.constant 1 : index
    %c16_276 = arith.constant 16 : index
    %c0_277 = arith.constant 0 : index
    %462 = vector.load %arg14[%c1_275, %c16_276, %c0_277] : memref<2x160x48xbf16, #tpu.memory_space<vmem>>, vector<1x8x48xbf16>
    %463 = vector.shape_cast %462 : vector<1x8x48xbf16> to vector<8x48xbf16>
    %464 = vector.shape_cast %461 : vector<8x48xbf16> to vector<1x8x48xbf16>
    tpu.vector_store %arg14[%c1_275, %c16_276, %c0_277], %464 {strides = array<i32>} : memref<2x160x48xbf16, #tpu.memory_space<vmem>>, vector<1x8x48xbf16>,
    %465 = vector.extract_strided_slice %452 {offsets = [0, 144], sizes = [8, 48], strides = [1, 1]} : vector<8x192xbf16> to vector<8x48xbf16>
    %c1_278 = arith.constant 1 : index
    %c24_279 = arith.constant 24 : index
    %c0_280 = arith.constant 0 : index
    %466 = vector.load %arg14[%c1_278, %c24_279, %c0_280] : memref<2x160x48xbf16, #tpu.memory_space<vmem>>, vector<1x8x48xbf16>
    %467 = vector.shape_cast %466 : vector<1x8x48xbf16> to vector<8x48xbf16>
    %468 = vector.shape_cast %465 : vector<8x48xbf16> to vector<1x8x48xbf16>
    tpu.vector_store %arg14[%c1_278, %c24_279, %c0_280], %468 {strides = array<i32>} : memref<2x160x48xbf16, #tpu.memory_space<vmem>>, vector<1x8x48xbf16>,
    %c1_281 = arith.constant 1 : index
    %c0_282 = arith.constant 0 : index
    %c0_283 = arith.constant 0 : index
    %469 = vector.load %arg14[%c1_281, %c0_282, %c0_283] : memref<2x160x48xbf16, #tpu.memory_space<vmem>>, vector<1x32x48xbf16>
    %470 = vector.shape_cast %469 : vector<1x32x48xbf16> to vector<32x48xbf16>
    %cst_284 = arith.constant dense<0.000000e+00> : vector<4x48xf32>
    %471 = tpu.matmul %426, %470, %cst_284 {dimension_numbers = #tpu.dot_dimension_numbers<[1], [0], [0], [1], [0, 0, 1, 1], [], []>} : vector<4x32xbf16>, vector<32x48xbf16>, vector<4x48xf32> -> vector<4x48xf32>
    %472 = math.tanh %449 : vector<4x48xf32>
    %473 = math.tanh %471 : vector<4x48xf32>
    %c0_285 = arith.constant 0 : index
    %c0_286 = arith.constant 0 : index
    %c0_287 = arith.constant 0 : index
    %474 = vector.load %arg13[%c0_285, %c0_286, %c0_287] : memref<2x4x48xf32, #tpu.memory_space<vmem>>, vector<1x4x48xf32>
    %475 = vector.shape_cast %474 : vector<1x4x48xf32> to vector<4x48xf32>
    %476 = vector.shape_cast %472 : vector<4x48xf32> to vector<1x4x48xf32>
    tpu.vector_store %arg13[%c0_285, %c0_286, %c0_287], %476 {strides = array<i32>} : memref<2x4x48xf32, #tpu.memory_space<vmem>>, vector<1x4x48xf32>,
    %c1_288 = arith.constant 1 : index
    %c0_289 = arith.constant 0 : index
    %c0_290 = arith.constant 0 : index
    %477 = vector.load %arg13[%c1_288, %c0_289, %c0_290] : memref<2x4x48xf32, #tpu.memory_space<vmem>>, vector<1x4x48xf32>
    %478 = vector.shape_cast %477 : vector<1x4x48xf32> to vector<4x48xf32>
    %479 = vector.shape_cast %473 : vector<4x48xf32> to vector<1x4x48xf32>
    tpu.vector_store %arg13[%c1_288, %c0_289, %c0_290], %479 {strides = array<i32>} : memref<2x4x48xf32, #tpu.memory_space<vmem>>, vector<1x4x48xf32>,
    return
  }
}

</mosaic_0001>

<bundles_post_ra>
// kernel: a_call__.1
= control target key start
LH: loop header
LB: loop body
LE: loop exit
PB: predicated region body
PF: predicated region fallthrough
CT: control target
= control target key end

     0   :  { %18 = vsyncpa [#allocation4], 0  ;;  %s3047_s0 = inlined_call_operand.vmem [shape: bf16[2,4,48], index: 0, kind: input, shape index: {}]   ;;  %s3048_s1 = inlined_call_operand.hbm [shape: bf16[8,16], index: 1, kind: input, shape index: {}]   ;;  %s3049_s2 = inlined_call_operand.vmem [shape: bf16[16,32], index: 2, kind: input, shape index: {}]   ;;  %s3050_s3 = inlined_call_operand.vmem [shape: bf16[32,80], index: 3, kind: input, shape index: {}]   ;;  %s3051_s4 = inlined_call_operand.vmem [shape: bf16[16,160], index: 4, kind: input, shape index: {}]   ;;  %s3052_s5 = inlined_call_operand.hbm [shape: bf16[8,64], index: 5, kind: input, shape index: {}]   ;;  %s3053_s6 = inlined_call_operand.hbm [shape: bf16[4,32], index: 6, kind: input, shape index: {}]   ;;  %s3054_s7 = inlined_call_operand.vmem [shape: bf16[48,96], index: 7, kind: input, shape index: {}]   ;;  %s3055_s8 = inlined_call_operand.hbm [shape: bf16[24,48], index: 8, kind: input, shape index: {}]   ;;  %s3056_s9 = inlined_call_operand.hbm [shape: bf16[12,20], index: 9, kind: input, shape index: {}]   ;;  %s3057_s10 = inlined_call_operand.hbm [shape: bf16[4,60], index: 10, kind: input, shape index: {}]   ;;  %s3058_s11 = inlined_call_operand.hbm [shape: bf16[12,96], index: 11, kind: input, shape index: {}]   ;;  %s3059_s12 = inlined_call_operand.vmem [shape: bf16[24,192], index: 12, kind: input, shape index: {}]   ;;  %s3060_s13 = inlined_call_operand.hbm [shape: f32[2,4,48], index: 13, kind: output, shape index: {}]  }
   0x1   :  { %19 = vsyncpa [#allocation7], 0 }
   0x2   :  { %20 = vsyncpa [#allocation10], 0 }
   0x3   :  { %21 = vsyncpa [#allocation13], 0 }
   0x4   :  { %22 = vsyncpa [#allocation5], 0  ;;  %s2507_s25 = smov [#allocation6]   ;;  %s2508_s27 = smov [#allocation9]  }
   0x5   :  { %s47_s26 = sshll.u32 %s2507_s25, 4  ;;  %s68_s28 = sshll.u32 %s2508_s27, 4  ;;  %s48_s26 = int_to_ptr.vmem [resolvable:$true] %s47_s26  ;;  %s2599_s28 = int_to_ptr.vmem [resolvable:$true] %s68_s28 }
   0x6   :  { %s2321_s14 = scalar_lea.hbm %s3052_s5, 64 }
   0x7   :  { %p2322_p0 = scmp.ne.s32.totalorder %s3052_s5, %s2321_s14  ;;  %p2325_p1 = scmp.lt.u32.totalorder %s2321_s14, %s3052_s5 }
   0x9   :  { %p2327_p2 = pnand %p2325_p1, %p2322_p0 }
   0xb   :  { %2330 = shalt.err (!%p2327_p2)
}
   0xc   :  { %s2331_s19 = scalar_lea.vmem %s48_s26, 64  ;;  %p2336_p4 = scmp.lt.s32.totalorder %s48_s26, %s48_s26 }
   0xd   :  { %p2332_p3 = scmp.ne.s32.totalorder %s48_s26, %s2331_s19  ;;  %p2337_p5 = scmp.lt.s32.totalorder %s2331_s19, %s2331_s19 }
   0xf   :  { %p2338_p6 = por %p2337_p5, %p2336_p4 }
  0x11   :  { %p2339_p7 = pnand %p2338_p6, %p2332_p3 }
  0x13   :  { %2342 = shalt.err (!%p2339_p7)
}
  0x14   :  { %50 = dma.hbm_to_vmem [thread:$0]  %s3052_s5, 64, %s48_s26, [#allocation7]  }
  0x15   :  { %s2343_s24 = scalar_lea.hbm %s3055_s8, 192 }
  0x16   :  { %p2344_p8 = scmp.ne.s32.totalorder %s3055_s8, %s2343_s24  ;;  %p2347_p9 = scmp.lt.u32.totalorder %s2343_s24, %s3055_s8 }
  0x18   :  { %p2349_p10 = pnand %p2347_p9, %p2344_p8 }
  0x1a   :  { %2352 = shalt.err (!%p2349_p10)
}
  0x1b   :  { %s2353_s14 = scalar_lea.vmem %s2599_s28, 192  ;;  %p2358_p12 = scmp.lt.s32.totalorder %s2599_s28, %s2599_s28 }
  0x1c   :  { %p2354_p11 = scmp.ne.s32.totalorder %s2599_s28, %s2353_s14  ;;  %p2359_p13 = scmp.lt.s32.totalorder %s2353_s14, %s2353_s14 }
  0x1e   :  { %p2360_p0 = por %p2359_p13, %p2358_p12 }
  0x20   :  { %p2361_p1 = pnand %p2360_p0, %p2354_p11 }
  0x22   :  { %2364 = shalt.err (!%p2361_p1)
}
  0x23   :  { %s2509_s5 = smov 64   ;;  %s2510_s26 = smov 4  }
  0x24   :  { %74 = dma.hbm_to_vmem [thread:$0]  %s3055_s8, 192, %s2599_s28, [#allocation10], %s2509_s5, %s2509_s5, %s2510_s26  }
  0x25   :  { %s2511_s17 = smov [#allocation12]   ;;  %s2512_s19 = smov [#allocation3]  }
  0x26   :  { %s93_s18 = sshll.u32 %s2511_s17, 4  ;;  %s31_s20 = sshll.u32 %s2512_s19, 4  ;;  %s94_s18 = int_to_ptr.vmem [resolvable:$true] %s93_s18  ;;  %s32_s20 = int_to_ptr.vmem [resolvable:$true] %s31_s20 }
  0x27   :  { %s2365_s23 = scalar_lea.hbm %s3057_s10, 32 }
  0x28   :  { %p2366_p2 = scmp.ne.s32.totalorder %s3057_s10, %s2365_s23  ;;  %p2369_p3 = scmp.lt.u32.totalorder %s2365_s23, %s3057_s10 }
  0x2a   :  { %p2371_p4 = pnand %p2369_p3, %p2366_p2 }
  0x2c   :  { %2374 = shalt.err (!%p2371_p4)
}
  0x2d   :  { %s2375_s8 = scalar_lea.vmem %s94_s18, 32  ;;  %p2380_p6 = scmp.lt.s32.totalorder %s94_s18, %s94_s18 }
  0x2e   :  { %p2376_p5 = scmp.ne.s32.totalorder %s94_s18, %s2375_s8  ;;  %p2381_p7 = scmp.lt.s32.totalorder %s2375_s8, %s2375_s8 }
  0x30   :  { %p2382_p8 = por %p2381_p7, %p2380_p6 }
  0x32   :  { %p2383_p9 = pnand %p2382_p8, %p2376_p5 }
  0x34   :  { %2386 = shalt.err (!%p2383_p9)
}
  0x35   :  { %96 = dma.hbm_to_vmem [thread:$0]  %s3057_s10, 32, %s94_s18, [#allocation13]  }
  0x36   :  { %s2387_s16 = scalar_lea.hbm %s3048_s1, 64 }
  0x37   :  { %p2388_p10 = scmp.ne.s32.totalorder %s3048_s1, %s2387_s16  ;;  %p2391_p11 = scmp.lt.u32.totalorder %s2387_s16, %s3048_s1 }
  0x39   :  { %p2393_p12 = pnand %p2391_p11, %p2388_p10 }
  0x3b   :  { %2396 = shalt.err (!%p2393_p12)
}
  0x3c   :  { %s2397_s23 = scalar_lea.vmem %s32_s20, 64  ;;  %p2402_p0 = scmp.lt.s32.totalorder %s32_s20, %s32_s20 }
  0x3d   :  { %p2398_p13 = scmp.ne.s32.totalorder %s32_s20, %s2397_s23  ;;  %p2403_p1 = scmp.lt.s32.totalorder %s2397_s23, %s2397_s23 }
  0x3f   :  { %p2404_p2 = por %p2403_p1, %p2402_p0 }
  0x41   :  { %p2405_p3 = pnand %p2404_p2, %p2398_p13 }
  0x43   :  { %2408 = shalt.err (!%p2405_p3)
}
  0x44   :  { %34 = dma.hbm_to_vmem [thread:$0]  %s3048_s1, 64, %s32_s20, [#allocation4]  }
  0x45   :  { %s2513_s24 = smov [#allocation8]   ;;  %s2514_s27 = smov [#allocation11]  }
  0x46   :  { %s57_s25 = sshll.u32 %s2513_s24, 4  ;;  %s80_s29 = sshll.u32 %s2514_s27, 4  ;;  %s58_s25 = int_to_ptr.vmem [resolvable:$true] %s57_s25  ;;  %s2657_s29 = int_to_ptr.vmem [resolvable:$true] %s80_s29 }
  0x47   :  { %s2409_s30 = scalar_lea.hbm %s3053_s6, 32 }
  0x48   :  { %p2410_p4 = scmp.ne.s32.totalorder %s3053_s6, %s2409_s30  ;;  %p2413_p5 = scmp.lt.u32.totalorder %s2409_s30, %s3053_s6 }
  0x4a   :  { %p2415_p6 = pnand %p2413_p5, %p2410_p4 }
  0x4c   :  { %2418 = shalt.err (!%p2415_p6)
}
  0x4d   :  { %s2419_s1 = scalar_lea.vmem %s58_s25, 32  ;;  %p2424_p8 = scmp.lt.s32.totalorder %s58_s25, %s58_s25 }
  0x4e   :  { %p2420_p7 = scmp.ne.s32.totalorder %s58_s25, %s2419_s1  ;;  %p2425_p9 = scmp.lt.s32.totalorder %s2419_s1, %s2419_s1 }
  0x50   :  { %p2426_p10 = por %p2425_p9, %p2424_p8 }
  0x52   :  { %p2427_p11 = pnand %p2426_p10, %p2420_p7 }
  0x54   :  { %2430 = shalt.err (!%p2427_p11)
}
  0x55   :  { %60 = dma.hbm_to_vmem [thread:$0]  %s3053_s6, 32, %s58_s25, [#allocation7]  }
  0x56   :  { %s2431_s23 = scalar_lea.hbm %s3056_s9, 128 }
  0x57   :  { %p2432_p12 = scmp.ne.s32.totalorder %s3056_s9, %s2431_s23  ;;  %p2435_p13 = scmp.lt.u32.totalorder %s2431_s23, %s3056_s9 }
  0x59   :  { %p2437_p0 = pnand %p2435_p13, %p2432_p12 }
  0x5b   :  { %2440 = shalt.err (!%p2437_p0)
}
  0x5c   :  { %s2441_s8 = scalar_lea.vmem %s2657_s29, 128  ;;  %p2446_p2 = scmp.lt.s32.totalorder %s2657_s29, %s2657_s29 }
  0x5d   :  { %p2442_p1 = scmp.ne.s32.totalorder %s2657_s29, %s2441_s8  ;;  %p2447_p3 = scmp.lt.s32.totalorder %s2441_s8, %s2441_s8 }
  0x5f   :  { %p2448_p4 = por %p2447_p3, %p2446_p2 }
  0x61   :  { %p2449_p5 = pnand %p2448_p4, %p2442_p1 }
  0x63   :  { %2452 = shalt.err (!%p2449_p5)
}
  0x64   :  { %86 = dma.hbm_to_vmem [thread:$0]  %s3056_s9, 128, %s2657_s29, [#allocation10], %s2509_s5, %s2509_s5, %s2510_s26  }
  0x65   :  { %s2515_s28 = smov [#allocation14]   ;;  %s2453_s16 = scalar_lea.hbm %s3058_s11, 128 }
  0x66   :  { %s102_s30 = sshll.u32 %s2515_s28, 4  ;;  %p2454_p6 = scmp.ne.s32.totalorder %s3058_s11, %s2453_s16  ;;  %s103_s30 = int_to_ptr.vmem [resolvable:$true] %s102_s30 }
  0x67   :  { %p2457_p7 = scmp.lt.u32.totalorder %s2453_s16, %s3058_s11 }
  0x69   :  { %p2459_p8 = pnand %p2457_p7, %p2454_p6 }
  0x6b   :  { %2462 = shalt.err (!%p2459_p8)
}
  0x6c   :  { %s2463_s21 = scalar_lea.vmem %s103_s30, 128  ;;  %p2468_p10 = scmp.lt.s32.totalorder %s103_s30, %s103_s30 }
  0x6d   :  { %p2464_p9 = scmp.ne.s32.totalorder %s103_s30, %s2463_s21  ;;  %p2469_p11 = scmp.lt.s32.totalorder %s2463_s21, %s2463_s21 }
  0x6f   :  { %p2470_p12 = por %p2469_p11, %p2468_p10 }
  0x71   :  { %p2471_p13 = pnand %p2470_p12, %p2464_p9 }
  0x73   :  { %2474 = shalt.err (!%p2471_p13)
}
  0x74   :  { %108 = dma.hbm_to_vmem [thread:$0]  %s3058_s11, 128, %s103_s30, [#allocation13], %s2509_s5, %s2509_s5, %s2510_s26  }
  0x75   :  { %2497 = dma.done.wait [#allocation4], 64  }
  0x76   :  { %2498 = vsyncadd [#allocation4], 4294967232 }
  0x77   :  { %2499 = dma.done.wait [#allocation7], 96  }
  0x78   :  { %2500 = vsyncadd [#allocation7], 4294967200 }
  0x79   :  { %2501 = dma.done.wait [#allocation10], 320  }
  0x7a   :  { %2502 = vsyncadd [#allocation10], 4294966976 }
  0x7b   :  { %2503 = dma.done.wait [#allocation13], 160  }
  0x7c   :  { %2504 = vsyncadd [#allocation13], 4294967136  ;;  %v2516_v0 = vmov 0.0   ;;  %vm2517_vm0 = vmmov 0   ;;  %v2281_v1 = vld [vmem:[%s3054_s7] sm:$0xff]   ;;  %v2282_v2 = vld [vmem:[%s3054_s7 + $0x8] sm:$0xff]  }
  0x7d   :  { %2089 = vmatprep.subr.bf16.mxu0 %v2516_v0  ;;  %2095 = vmatprep.mubr.msk.bf16.mxu0 %vm2517_vm0, %v2516_v0  ;;  %v2283_v3 = vld [vmem:[%s3054_s7 + $0x10] sm:$0xff]   ;;  %v133_v4 = vld [vmem:[%s3047_s0] sm:$0x3]  ;;  %vm161_vm1 = vcmask 392192   ;;  %vm206_vm2 = vcmask 189440   ;;  %s2518_s7 = smov 56  }
  0x7e   :  { %2099 = vmatprep.subr.bf16.mxu1 %v2516_v0  ;;  %2101 = vmatprep.mubr.msk.bf16.mxu1 %vm2517_vm0, %v2516_v0  ;;  %s2519_s6 = smov 104   ;;  %s2520_s25 = smov 80   ;;  %vm225_vm3 = vcmask 195590   ;;  %vm213_vm4 = vcmask 191490   ;;  %vm219_vm5 = vcmask 193540   ;;  %vm228_vm6 = vcmask 130048  }
  0x7f   :  { %2090 = vmatpush3.bf16.msra.mxu0 %v2281_v1  ;;  %v136_v17 = vld [vmem:[#allocation3] sm:$0xf]  ;;  %v2284_v19 = vld [vmem:[#allocation9] sm:$0xff]   ;;  %v2285_v20 = vld [vmem:[#allocation9 + $0x8] ss:$0 sps:$4 sm:$0xff]   ;;  %vm400_vm7 = vcmask 1043456  }
  0x80   :  { %2091 = vmatprep.subr.bf16.mxu0 %v2516_v0  ;;  %v1974_v18 = vld [vmem:[%s3047_s0 + $0x2] sm:$0x3]  ;;  %v402_v21 = vsel %vm400_vm7, %v2285_v20, 0  ;;  %vm396_vm9 = vcmask 195584   ;;  %vm445_vm10 = vcmask 93184   ;;  %s2521_s0 = smov 116  }
  0x81   :  { %s2522_s14 = smov 92   ;;  %vm452_vm11 = vcmask 97284   ;;  %v2286_v59 = vld [vmem:[%s3049_s2] sm:$0xff]   ;;  %vm469_vm13 = vcmask 261120   ;;  %vm617_vm14 = vcmask 97280   ;;  %vm698_vm15 = vcmask 1045504  }
  0x82   :  { %s2523_s2 = smov 124   ;;  %s2524_s17 = smov 120  }
  0x83   :  { %2092 = vmatpush3.bf16.msra.mxu0 %v2282_v2  ;;  %s2525_s19 = smov 112   ;;  %s2528_s8 = smov [#allocation15]  }
  0x84   :  { %2093 = vmatprep.subr.bf16.mxu0 %v2516_v0 }
  0x87   :  { %2094 = vmatpush3.bf16.msra.mxu0 %v2283_v3 }
  0x88   :  { %2115 = vmatprep.subr.bf16.mxu0 %v2516_v0 }
  0x8a   :  { %2096 = vmatmul.mubr.msk.bf16.vlgmr.msra.gmra.mrb[0].mxu0 %vm161_vm1, %v133_v4 }
  0x8b   :  { %2117 = vmatprep.mubr.msk.bf16.mxu0 %vm2517_vm0, %v2516_v0 }
 0x15d   :  { %v199_v5 = vpop.f32.mrb[0].mxu0 }
 0x15e   :  { %v205_v6 = vpack.c.bf16 %v199_v5, %v199_v5  ;;  %v2097_v7 = vpop.f32.mrb[1].mxu0 }
 0x15f   :  { %v202_v8 = vpop.f32.mrb[2].mxu0 }
 0x160   :  { %207 = vst.msk [vmem:[#allocation2] sm:$0x3] %vm206_vm2, %v205_v6  ;;  %v2098_v9 = vpop.f32.mrb[3].mxu0  ;;  %v221_v10 = vrot.slane %v205_v6, 2  ;;  %v209_v11 = vrot.slane %v205_v6, 6  ;;  %v215_v12 = vrot.slane %v205_v6, 4 }
 0x162   :  { %222 = vrot.lane.b32.xlu1 %v221_v10, %s2518_s7  ;;  %210 = vrot.lane.b32.xlu0 %v209_v11, %s2519_s6 }
 0x166   :  { %216 = vrot.lane.b32.xlu0 %v215_v12, %s2520_s25 }
 0x1d4   :  { %v223_v13 = vpop.permute.xlu1 %222  ;;  %v211_v14 = vpop.permute.xlu0 %210 }
 0x1d5   :  { %226 = vst.msk [vmem:[#allocation2] sm:$0xc0] %vm225_vm3, %v223_v13 }
 0x1d6   :  { %214 = vst.msk [vmem:[#allocation2] sm:$0xc] %vm213_vm4, %v211_v14 }
 0x1d8   :  { %v217_v15 = vpop.permute.xlu0 %216 }
 0x1d9   :  { %220 = vst.msk [vmem:[#allocation2] sm:$0x30] %vm219_vm5, %v217_v15 }
 0x1e0   :  { %v227_v16 = vld [vmem:[#allocation2] sm:$0xff] }
 0x1e1   :  { %2100 = vmatpush3.bf16.msra.mxu1 %v227_v16 }
 0x1e2   :  { %2105 = vmatprep.subr.bf16.mxu1 %v2516_v0 }
 0x1e4   :  { %2102 = vmatmul.mubr.msk.bf16.vlgmr.msra.gmra.mrb[0].mxu1 %vm228_vm6, %v136_v17 }
 0x1e5   :  { %2106 = vmatpush3.bf16.msra.mxu1 %v2281_v1  ;;  %2111 = vmatprep.mubr.msk.bf16.mxu1 %vm2517_vm0, %v2516_v0 }
 0x1e6   :  { %2107 = vmatprep.subr.bf16.mxu1 %v2516_v0 }
 0x1e9   :  { %2108 = vmatpush3.bf16.msra.mxu1 %v2282_v2 }
 0x1ea   :  { %2109 = vmatprep.subr.bf16.mxu1 %v2516_v0 }
 0x1ed   :  { %2110 = vmatpush3.bf16.msra.mxu1 %v2283_v3 }
 0x1ee   :  { %2121 = vmatprep.subr.bf16.mxu1 %v2516_v0 }
 0x1f0   :  { %2112 = vmatmul.mubr.msk.bf16.vlgmr.msra.gmra.mrb[4].mxu1 %vm161_vm1, %v1974_v18 }
 0x1f1   :  { %2122 = vmatpush3.bf16.msra.mxu1 %v2284_v19  ;;  %2125 = vmatprep.mubr.msk.bf16.mxu1 %vm2517_vm0, %v2516_v0 }
 0x1f2   :  { %2123 = vmatprep.subr.bf16.mxu1 %v2516_v0 }
 0x1f5   :  { %2124 = vmatpush3.bf16.msra.mxu1 %v402_v21 }
 0x1f6   :  { %2137 = vmatprep.subr.bf16.mxu1 %v2516_v0 }
 0x2b7   :  { %v266_v22 = vpop.f32.mrb[0].mxu1 }
 0x2b8   :  { %vm375_vm8 = vcmp.gt.f32.partialorder %v266_v22, 0.0  ;;  %v376_v23 = vmul.f32 0.2, %v266_v22  ;;  %v2103_v24 = vpop.f32.mrb[1].mxu1 }
 0x2b9   :  { %v269_v25 = vpop.f32.mrb[2].mxu1 }
 0x2ba   :  { %v377_v26 = vsel %vm375_vm8, %v266_v22, %v376_v23  ;;  %v2104_v27 = vpop.f32.mrb[3].mxu1  ;;  %vm1092_vm8 = vcmask 1041408  }
 0x2bb   :  { %v386_v28 = vpack.c.bf16 %v377_v26, %v377_v26 }
 0x2bd   :  { %2126 = vmatmul.mubr.msk.bf16.vlgmr.msra.gmra.mrb[8].mxu1 %vm396_vm9, %v386_v28 }
 0x2be   :  { %2138 = vmatpush3.bf16.msra.mxu1 %v2284_v19  ;;  %2141 = vmatprep.mubr.msk.bf16.mxu1 %vm2517_vm0, %v2516_v0 }
 0x2bf   :  { %2139 = vmatprep.subr.bf16.mxu1 %v2516_v0 }
 0x2c2   :  { %2140 = vmatpush3.bf16.msra.mxu1 %v402_v21 }
 0x2c3   :  { %v309_v29 = vpop.f32.mrb[4].mxu1  ;;  %2153 = vmatprep.subr.bf16.mxu1 %v2516_v0 }
 0x2c4   :  { %v315_v30 = vpack.c.bf16 %v309_v29, %v309_v29  ;;  %v2113_v31 = vpop.f32.mrb[5].mxu1 }
 0x2c5   :  { %v312_v32 = vpop.f32.mrb[6].mxu1 }
 0x2c6   :  { %317 = vst.msk [vmem:[#allocation2 + $0x50] sm:$0x3] %vm206_vm2, %v315_v30  ;;  %v2114_v33 = vpop.f32.mrb[7].mxu1  ;;  %v324_v34 = vrot.slane %v315_v30, 4  ;;  %v319_v35 = vrot.slane %v315_v30, 6  ;;  %v329_v36 = vrot.slane %v315_v30, 2 }
 0x2c8   :  { %325 = vrot.lane.b32.xlu0 %v324_v34, %s2520_s25  ;;  %320 = vrot.lane.b32.xlu1 %v319_v35, %s2519_s6 }
 0x2cc   :  { %330 = vrot.lane.b32.xlu1 %v329_v36, %s2518_s7 }
 0x33a   :  { %v326_v37 = vpop.permute.xlu0 %325  ;;  %v321_v38 = vpop.permute.xlu1 %320 }
 0x33b   :  { %328 = vst.msk [vmem:[#allocation2 + $0x50] sm:$0x30] %vm219_vm5, %v326_v37  ;;  %vm744_vm5 = vcmask 31744  }
 0x33c   :  { %323 = vst.msk [vmem:[#allocation2 + $0x50] sm:$0xc] %vm213_vm4, %v321_v38 }
 0x33e   :  { %v331_v39 = vpop.permute.xlu1 %330 }
 0x33f   :  { %333 = vst.msk [vmem:[#allocation2 + $0x50] sm:$0xc0] %vm225_vm3, %v331_v39 }
 0x346   :  { %v334_v40 = vld [vmem:[#allocation2 + $0x50] sm:$0xff] }
 0x347   :  { %2116 = vmatpush3.bf16.msra.mxu0 %v334_v40  ;;  %v2287_v40 = vld [vmem:[#allocation11] sm:$0x3f]  }
 0x348   :  { %2129 = vmatprep.subr.bf16.mxu0 %v2516_v0 }
 0x34a   :  { %2118 = vmatmul.mubr.msk.bf16.vlgmr.msra.gmra.mrb[4].mxu0 %vm228_vm6, %v136_v17  ;;  %vm778_vm6 = vcmask 654336  }
 0x34b   :  { %2133 = vmatprep.mubr.msk.bf16.mxu0 %vm2517_vm0, %v2516_v0 }
 0x390   :  { %v438_v41 = vpop.f32.mrb[8].mxu1 }
 0x391   :  { %v444_v42 = vpack.c.bf16 %v438_v41, %v438_v41  ;;  %v2127_v43 = vpop.f32.mrb[9].mxu1  ;;  %v700_v41 = vsel %vm698_vm15, %v2287_v40, 0 }
 0x392   :  { %v441_v44 = vpop.f32.mrb[10].mxu1 }
 0x393   :  { %454 = vrot.lane.b32.xlu1 %v444_v42, %s2519_s6  ;;  %v2128_v45 = vpop.f32.mrb[11].mxu1  ;;  %v448_v46 = vrot.slane %v444_v42, 4  ;;  %446 = vst.msk [vmem:[#allocation2] sm:$0xf] %vm445_vm10, %v444_v42 }
 0x395   :  { %449 = vrot.lane.b32.xlu0 %v448_v46, %s2521_s0 }
 0x399   :  { %458 = vrot.lane.b32.xlu0 %v448_v46, %s2522_s14 }
 0x405   :  { %v455_v47 = vpop.permute.xlu1 %454 }
 0x406   :  { %457 = vst.msk [vmem:[#allocation2 + $0x8] sm:$0xf] %vm445_vm10, %v455_v47 }
 0x407   :  { %v450_v48 = vpop.permute.xlu0 %449 }
 0x408   :  { %453 = vst.msk [vmem:[#allocation2] sm:$0xf0] %vm452_vm11, %v450_v48 }
 0x40b   :  { %v459_v49 = vpop.permute.xlu0 %458 }
 0x40c   :  { %461 = vst.msk [vmem:[#allocation2 + $0x8] sm:$0xf0] %vm452_vm11, %v459_v49 }
 0x40f   :  { %v462_v50 = vld [vmem:[#allocation2] sm:$0xff] }
 0x410   :  { %2130 = vmatpush3.bf16.msra.mxu0 %v462_v50 }
 0x411   :  { %2131 = vmatprep.subr.bf16.mxu0 %v2516_v0 }
 0x413   :  { %v463_v51 = vld [vmem:[#allocation2 + $0x8] sm:$0xff] }
 0x414   :  { %2132 = vmatpush3.bf16.msra.mxu0 %v463_v51 }
 0x415   :  { %2145 = vmatprep.subr.bf16.mxu0 %v2516_v0 }
 0x417   :  { %2134 = vmatmul.mubr.msk.bf16.vlgmr.msra.gmra.mrb[8].mxu0 %vm469_vm13, %v2286_v59 }
 0x418   :  { %2149 = vmatprep.mubr.msk.bf16.mxu0 %vm2517_vm0, %v2516_v0 }
 0x41d   :  { %v369_v52 = vpop.f32.mrb[4].mxu0 }
 0x41e   :  { %vm378_vm12 = vcmp.gt.f32.partialorder %v369_v52, 0.0  ;;  %v379_v53 = vmul.f32 0.2, %v369_v52  ;;  %v2119_v54 = vpop.f32.mrb[5].mxu0 }
 0x41f   :  { %v372_v55 = vpop.f32.mrb[6].mxu0 }
 0x420   :  { %v380_v56 = vsel %vm378_vm12, %v369_v52, %v379_v53  ;;  %v2120_v57 = vpop.f32.mrb[7].mxu0 }
 0x421   :  { %v514_v58 = vpack.c.bf16 %v380_v56, %v380_v56 }
 0x423   :  { %2142 = vmatmul.mubr.msk.bf16.vlgmr.msra.gmra.mrb[12].mxu1 %vm396_vm9, %v514_v58 }
 0x424   :  { %2155 = vmatprep.mubr.msk.bf16.mxu1 %vm2517_vm0, %v2516_v0  ;;  %2154 = vmatpush3.bf16.msra.mxu1 %v700_v41 }
 0x425   :  { %2173 = vmatprep.subr.bf16.mxu1 %v2516_v0 }
 0x4ea   :  { %v507_v8 = vpop.f32.mrb[8].mxu0 }
 0x4eb   :  { %v2135_v9 = vpop.f32.mrb[9].mxu0  ;;  %v618_v10 = vsel %vm617_vm14, %v507_v8, 0.0 }
 0x4ec   :  { %v510_v11 = vpop.f32.mrb[10].mxu0 }
 0x4ed   :  { %v2136_v12 = vpop.f32.mrb[11].mxu0  ;;  %v621_v13 = vsel %vm617_vm14, %v510_v11, 0.0 }
 0x4f6   :  { %v552_v60 = vpop.f32.mrb[12].mxu1 }
 0x4f7   :  { %v558_v61 = vpack.c.bf16 %v552_v60, %v552_v60  ;;  %v2143_v62 = vpop.f32.mrb[13].mxu1 }
 0x4f8   :  { %v555_v63 = vpop.f32.mrb[14].mxu1 }
 0x4f9   :  { %559 = vst.msk [vmem:[#allocation2 + $0x50] sm:$0xf] %vm445_vm10, %v558_v61  ;;  %v2144_v1 = vpop.f32.mrb[15].mxu1  ;;  %566 = vrot.lane.b32.xlu0 %v558_v61, %s2519_s6  ;;  %v561_v2 = vrot.slane %v558_v61, 4 }
 0x4fb   :  { %562 = vrot.lane.b32.xlu1 %v561_v2, %s2521_s0 }
 0x4ff   :  { %570 = vrot.lane.b32.xlu1 %v561_v2, %s2522_s14 }
 0x518   :  { %619 = vadd.xlane.f32.xlu0 %v618_v10 }
 0x523   :  { %622 = vadd.xlane.f32.xlu1 %v621_v13 }
 0x56b   :  { %v567_v3 = vpop.permute.xlu0 %566 }
 0x56c   :  { %569 = vst.msk [vmem:[#allocation2 + $0x58] sm:$0xf] %vm445_vm10, %v567_v3 }
 0x56d   :  { %v563_v4 = vpop.permute.xlu1 %562 }
 0x56e   :  { %565 = vst.msk [vmem:[#allocation2 + $0x50] sm:$0xf0] %vm452_vm11, %v563_v4 }
 0x571   :  { %v571_v5 = vpop.permute.xlu1 %570 }
 0x572   :  { %573 = vst.msk [vmem:[#allocation2 + $0x58] sm:$0xf0] %vm452_vm11, %v571_v5 }
 0x575   :  { %v574_v6 = vld [vmem:[#allocation2 + $0x50] sm:$0xff] }
 0x576   :  { %2146 = vmatpush3.bf16.msra.mxu0 %v574_v6 }
 0x577   :  { %2147 = vmatprep.subr.bf16.mxu0 %v2516_v0 }
 0x579   :  { %v575_v7 = vld [vmem:[#allocation2 + $0x58] sm:$0xff] }
 0x57a   :  { %2148 = vmatpush3.bf16.msra.mxu0 %v575_v7 }
 0x57d   :  { %2150 = vmatmul.mubr.msk.bf16.vlgmr.msra.gmra.mrb[12].mxu0 %vm469_vm13, %v2286_v59 }
 0x5a5   :  { %v620_v20 = vpop.xlane.xlu0 %619 }
 0x5b0   :  { %v623_v24 = vpop.xlane.xlu1 %622 }
 0x650   :  { %v610_v14 = vpop.f32.mrb[12].mxu0 }
 0x651   :  { %v626_v15 = vsel %vm617_vm14, %v610_v14, 0.0  ;;  %v2151_v16 = vpop.f32.mrb[13].mxu0 }
 0x652   :  { %627 = vadd.xlane.f32.xlu0 %v626_v15  ;;  %v613_v17 = vpop.f32.mrb[14].mxu0  ;;  %v2288_v16 = vld [vmem:[%s3050_s3] sm:$0xff]  }
 0x653   :  { %v2152_v18 = vpop.f32.mrb[15].mxu0  ;;  %v629_v19 = vsel %vm617_vm14, %v613_v17, 0.0  ;;  %2169 = vmatprep.mubr.msk.bf16.mxu0 %vm778_vm6, %v2288_v16 }
 0x656   :  { %630 = vadd.xlane.f32.xlu0 %v629_v19 }
 0x6df   :  { %v628_v21 = vpop.xlane.xlu0 %627 }
 0x6e0   :  { %v632_v22 = vadd.f32 %v628_v21, %v620_v20 }
 0x6e2   :  { %v635_v23 = vmul.f32 0.041666668, %v632_v22 }
 0x6e3   :  { %v631_v25 = vpop.xlane.xlu0 %630 }
 0x6e4   :  { %v637_v26 = vsub.f32 %v507_v8, %v635_v23  ;;  %v649_v27 = vsub.f32 %v610_v14, %v635_v23  ;;  %v633_v28 = vadd.f32 %v631_v25, %v623_v24 }
 0x6e6   :  { %v636_v29 = vmul.f32 0.041666668, %v633_v28  ;;  %v639_v30 = vmul.f32 %v637_v26, %v637_v26  ;;  %v651_v34 = vmul.f32 %v649_v27, %v649_v27 }
 0x6e8   :  { %v638_v31 = vsub.f32 %v510_v11, %v636_v29  ;;  %v650_v32 = vsub.f32 %v613_v17, %v636_v29  ;;  %v641_v33 = vsel %vm617_vm14, %v639_v30, 0.0  ;;  %v653_v36 = vsel %vm617_vm14, %v651_v34, 0.0 }
 0x6e9   :  { %642 = vadd.xlane.f32.xlu1 %v641_v33  ;;  %v2289_v33 = vld [vmem:[%s3050_s3 + $0x8] sm:$0xff]  }
 0x6ea   :  { %v640_v35 = vmul.f32 %v638_v31, %v638_v31  ;;  %v652_v38 = vmul.f32 %v650_v32, %v650_v32 }
 0x6ec   :  { %v644_v37 = vsel %vm617_vm14, %v640_v35, 0.0  ;;  %v656_v39 = vsel %vm617_vm14, %v652_v38, 0.0 }
 0x6ed   :  { %654 = vadd.xlane.f32.xlu1 %v653_v36  ;;  %645 = vadd.xlane.f32.xlu0 %v644_v37 }
 0x6f1   :  { %657 = vadd.xlane.f32.xlu0 %v656_v39 }
 0x776   :  { %v643_v42 = vpop.xlane.xlu1 %642 }
 0x77a   :  { %v655_v43 = vpop.xlane.xlu1 %654  ;;  %v646_v44 = vpop.xlane.xlu0 %645 }
 0x77b   :  { %v659_v45 = vadd.f32 %v655_v43, %v643_v42 }
 0x77d   :  { %v661_v46 = vmul.f32 0.041666668, %v659_v45 }
 0x77e   :  { %v658_v47 = vpop.xlane.xlu0 %657 }
 0x77f   :  { %v663_v48 = vadd.f32 1e-05, %v661_v46  ;;  %v660_v49 = vadd.f32 %v658_v47, %v646_v44 }
 0x781   :  { %2299 = vrsqrt.f32 %v663_v48  ;;  %v662_v50 = vmul.f32 0.041666668, %v660_v49 }
 0x783   :  { %v664_v51 = vadd.f32 1e-05, %v662_v50 }
 0x785   :  { %2301 = vrsqrt.f32 %v664_v51 }
 0x78b   :  { %v2300_v52 = vpop.eup %2299 }
 0x78c   :  { %v667_v53 = vmul.f32 %v2300_v52, %v637_v26  ;;  %v669_v59 = vmul.f32 %v2300_v52, %v649_v27 }
 0x78e   :  { %v673_v56 = vmul.f32 0.2, %v667_v53  ;;  %vm671_vm1 = vcmp.gt.f32.partialorder %v667_v53, 0.0  ;;  %v679_v1 = vmul.f32 0.2, %v669_v59  ;;  %vm677_vm4 = vcmp.gt.f32.partialorder %v669_v59, 0.0 }
 0x78f   :  { %v2302_v54 = vpop.eup %2301 }
 0x790   :  { %v668_v55 = vmul.f32 %v2302_v54, %v638_v31  ;;  %v670_v57 = vmul.f32 %v2302_v54, %v650_v32  ;;  %v675_v60 = vsel %vm671_vm1, %v667_v53, %v673_v56  ;;  %v681_v3 = vsel %vm677_vm4, %v669_v59, %v679_v1 }
 0x792   :  { %vm672_vm2 = vcmp.gt.f32.partialorder %v668_v55, 0.0  ;;  %v674_v58 = vmul.f32 0.2, %v668_v55  ;;  %v680_v63 = vmul.f32 0.2, %v670_v57  ;;  %vm678_vm3 = vcmp.gt.f32.partialorder %v670_v57, 0.0 }
 0x794   :  { %v676_v61 = vsel %vm672_vm2, %v668_v55, %v674_v58  ;;  %v682_v2 = vsel %vm678_vm3, %v670_v57, %v680_v63 }
 0x795   :  { %v689_v62 = vpack.c.bf16 %v676_v61, %v675_v60  ;;  %v834_v4 = vpack.c.bf16 %v682_v2, %v681_v3 }
 0x797   :  { %2156 = vmatmul.mubr.msk.bf16.vlgmr.msra.gmra.mrb[16].mxu1 %vm617_vm14, %v689_v62 }
 0x798   :  { %2174 = vmatpush3.bf16.msra.mxu1 %v700_v41  ;;  %2175 = vmatprep.mubr.msk.bf16.mxu1 %vm2517_vm0, %v2516_v0 }
 0x79f   :  { %2176 = vmatmul.mubr.msk.bf16.vlgmr.msra.gmra.mrb[20].mxu1 %vm617_vm14, %v834_v4 }
 0x7a0   :  { %2189 = vmatprep.mubr.msk.bf16.mxu1 %vm778_vm6, %v2288_v16 }
 0x86a   :  { %v736_v5 = vpop.f32.mrb[16].mxu1 }
 0x86b   :  { %v2157_v6 = vpop.f32.mrb[17].mxu1 }
 0x86c   :  { %v739_v7 = vpop.f32.mrb[18].mxu1 }
 0x86d   :  { %v743_v8 = vpack.c.bf16 %v739_v7, %v736_v5  ;;  %v2158_v9 = vpop.f32.mrb[19].mxu1 }
 0x86f   :  { %745 = vst.msk [vmem:[#allocation2] sm:$0xff] %vm744_vm5, %v743_v8  ;;  %747 = vrot.lane.b32.xlu1 %v743_v8, %s2523_s2 }
 0x872   :  { %v872_v10 = vpop.f32.mrb[20].mxu1 }
 0x873   :  { %751 = vrot.lane.b32.xlu1 %v743_v8, %s2524_s17  ;;  %v2177_v11 = vpop.f32.mrb[21].mxu1 }
 0x874   :  { %v875_v12 = vpop.f32.mrb[22].mxu1 }
 0x875   :  { %v879_v13 = vpack.c.bf16 %v875_v12, %v872_v10  ;;  %v2178_v14 = vpop.f32.mrb[23].mxu1 }
 0x876   :  { %v763_v15 = vld [vmem:[#allocation2] sm:$0xff] }
 0x877   :  { %880 = vst.msk [vmem:[#allocation2 + $0x50] sm:$0xff] %vm744_vm5, %v879_v13  ;;  %2159 = vmatprep.subr.bf16.mxu0 %v763_v15  ;;  %886 = vrot.lane.b32.xlu1 %v879_v13, %s2524_s17 }
 0x878   :  { %882 = vrot.lane.b32.xlu0 %v879_v13, %s2523_s2  ;;  %2160 = vmatpush3.bf16.msra.mxu0 %v763_v15 }
 0x87b   :  { %890 = vrot.lane.b32.xlu1 %v879_v13, %s2521_s0 }
 0x87c   :  { %755 = vrot.lane.b32.xlu0 %v743_v8, %s2521_s0 }
 0x87e   :  { %v898_v17 = vld [vmem:[#allocation2 + $0x50] sm:$0xff] }
 0x87f   :  { %894 = vrot.lane.b32.xlu1 %v879_v13, %s2525_s19  ;;  %2179 = vmatprep.subr.bf16.mxu1 %v898_v17 }
 0x880   :  { %759 = vrot.lane.b32.xlu0 %v743_v8, %s2525_s19  ;;  %2180 = vmatpush3.bf16.msra.mxu1 %v898_v17 }
 0x8e1   :  { %v748_v18 = vpop.permute.xlu1 %747 }
 0x8e2   :  { %750 = vst.msk [vmem:[#allocation2 + $0x8] sm:$0xff] %vm744_vm5, %v748_v18 }
 0x8e5   :  { %v752_v19 = vpop.permute.xlu1 %751 }
 0x8e6   :  { %754 = vst.msk [vmem:[#allocation2 + $0x10] sm:$0xff] %vm744_vm5, %v752_v19 }
 0x8e9   :  { %v887_v20 = vpop.permute.xlu1 %886  ;;  %v764_v21 = vld [vmem:[#allocation2 + $0x8] sm:$0xff] }
 0x8ea   :  { %889 = vst.msk [vmem:[#allocation2 + $0x60] sm:$0xff] %vm744_vm5, %v887_v20  ;;  %v883_v22 = vpop.permute.xlu0 %882  ;;  %2161 = vmatprep.subr.bf16.mxu0 %v764_v21 }
 0x8eb   :  { %885 = vst.msk [vmem:[#allocation2 + $0x58] sm:$0xff] %vm744_vm5, %v883_v22  ;;  %2162 = vmatpush3.bf16.msra.mxu0 %v764_v21 }
 0x8ed   :  { %v891_v23 = vpop.permute.xlu1 %890  ;;  %v765_v24 = vld [vmem:[#allocation2 + $0x10] sm:$0xff] }
 0x8ee   :  { %893 = vst.msk [vmem:[#allocation2 + $0x68] sm:$0xff] %vm744_vm5, %v891_v23  ;;  %v756_v25 = vpop.permute.xlu0 %755  ;;  %2163 = vmatprep.subr.bf16.mxu0 %v765_v24 }
 0x8ef   :  { %758 = vst.msk [vmem:[#allocation2 + $0x18] sm:$0xff] %vm744_vm5, %v756_v25  ;;  %2164 = vmatpush3.bf16.msra.mxu0 %v765_v24 }
 0x8f1   :  { %v895_v26 = vpop.permute.xlu1 %894  ;;  %v900_v29 = vld [vmem:[#allocation2 + $0x60] sm:$0xff] }
 0x8f2   :  { %897 = vst.msk [vmem:[#allocation2 + $0x70] sm:$0xff] %vm744_vm5, %v895_v26  ;;  %v760_v27 = vpop.permute.xlu0 %759  ;;  %v899_v28 = vld [vmem:[#allocation2 + $0x58] sm:$0xff] }
 0x8f3   :  { %762 = vst.msk [vmem:[#allocation2 + $0x20] sm:$0xff] %vm744_vm5, %v760_v27  ;;  %2181 = vmatprep.subr.bf16.mxu1 %v899_v28 }
 0x8f4   :  { %2182 = vmatpush3.bf16.msra.mxu1 %v899_v28  ;;  %v1083_v28 = vld [vmem:[#allocation12] sm:$0x3] }
 0x8f5   :  { %2183 = vmatprep.subr.bf16.mxu1 %v900_v29  ;;  %v901_v31 = vld [vmem:[#allocation2 + $0x68] sm:$0xff] }
 0x8f6   :  { %v766_v30 = vld [vmem:[#allocation2 + $0x18] sm:$0xff] }
 0x8f7   :  { %2165 = vmatprep.subr.bf16.mxu0 %v766_v30 }
 0x8f8   :  { %2166 = vmatpush3.bf16.msra.mxu0 %v766_v30  ;;  %2184 = vmatpush3.bf16.msra.mxu1 %v900_v29  ;;  %v1094_v29 = vsel %vm1092_vm8, %v1083_v28, 0 }
 0x8f9   :  { %2185 = vmatprep.subr.bf16.mxu1 %v901_v31  ;;  %v902_v34 = vld [vmem:[#allocation2 + $0x70] sm:$0xff] }
 0x8fa   :  { %v767_v32 = vld [vmem:[#allocation2 + $0x20] sm:$0xff] }
 0x8fb   :  { %2167 = vmatprep.subr.bf16.mxu0 %v767_v32 }
 0x8fc   :  { %2168 = vmatpush3.bf16.msra.mxu0 %v767_v32  ;;  %2186 = vmatpush3.bf16.msra.mxu1 %v901_v31 }
 0x8fd   :  { %2187 = vmatprep.subr.bf16.mxu1 %v902_v34  ;;  %2257 = vmatprep.subr.msk.bf16.mxu0 %vm1092_vm8, %v1083_v28 }
 0x8ff   :  { %2170 = vmatmul.mubr.msk.bf16.vlgmr.msra.gmra.mrb[16].mxu0 %vm778_vm6, %v2289_v33 }
 0x900   :  { %2188 = vmatpush3.bf16.msra.mxu1 %v902_v34  ;;  %2194 = vmatpush3.bf16.msra.mxu0 %v1094_v29 }
 0x901   :  { %2258 = vmatprep.subr.msk.bf16.mxu1 %vm1092_vm8, %v1083_v28 }
 0x903   :  { %2190 = vmatmul.mubr.msk.bf16.vlgmr.msra.gmra.mrb[24].mxu1 %vm778_vm6, %v2289_v33 }
 0x904   :  { %2200 = vmatpush3.bf16.msra.mxu1 %v1094_v29 }
 0x9d2   :  { %v2171_v35 = vpop.f32.mrb[16].mxu0 }
 0x9d3   :  { %v819_v36 = vpop.f32.mrb[17].mxu0  ;;  %v958_v37 = vsel %vm744_vm5, %v2171_v35, 0.0 }
 0x9d4   :  { %959 = vadd.xlane.f32.xlu1 %v958_v37  ;;  %v952_v38 = vsel %vm744_vm5, %v819_v36, 0.0  ;;  %v2172_v39 = vpop.f32.mrb[18].mxu0 }
 0x9d5   :  { %953 = vadd.xlane.f32.xlu0 %v952_v38  ;;  %v822_v40 = vpop.f32.mrb[19].mxu0  ;;  %v961_v44 = vsel %vm744_vm5, %v2172_v39, 0.0 }
 0x9d6   :  { %v955_v41 = vsel %vm744_vm5, %v822_v40, 0.0  ;;  %v2191_v42 = vpop.f32.mrb[24].mxu1 }
 0x9d7   :  { %v937_v43 = vpop.f32.mrb[25].mxu1  ;;  %v974_v46 = vsel %vm744_vm5, %v2191_v42, 0.0 }
 0x9d8   :  { %956 = vadd.xlane.f32.xlu1 %v955_v41  ;;  %v2192_v45 = vpop.f32.mrb[26].mxu1  ;;  %v968_v48 = vsel %vm744_vm5, %v937_v43, 0.0 }
 0x9d9   :  { %962 = vadd.xlane.f32.xlu0 %v961_v44  ;;  %v940_v47 = vpop.f32.mrb[27].mxu1  ;;  %v977_v50 = vsel %vm744_vm5, %v2192_v45, 0.0 }
 0x9da   :  { %v971_v49 = vsel %vm744_vm5, %v940_v47, 0.0 }
 0x9dc   :  { %975 = vadd.xlane.f32.xlu1 %v974_v46 }
 0x9dd   :  { %969 = vadd.xlane.f32.xlu0 %v968_v48 }
 0x9e1   :  { %972 = vadd.xlane.f32.xlu0 %v971_v49 }
 0x9e5   :  { %978 = vadd.xlane.f32.xlu0 %v977_v50 }
 0xa61   :  { %v960_v51 = vpop.xlane.xlu1 %959 }
 0xa62   :  { %v954_v52 = vpop.xlane.xlu0 %953 }
 0xa65   :  { %v957_v53 = vpop.xlane.xlu1 %956 }
 0xa66   :  { %v963_v54 = vpop.xlane.xlu0 %962 }
 0xa69   :  { %v976_v55 = vpop.xlane.xlu1 %975 }
 0xa6a   :  { %v982_v56 = vadd.f32 %v976_v55, %v960_v51  ;;  %v970_v57 = vpop.xlane.xlu0 %969 }
 0xa6b   :  { %v980_v58 = vadd.f32 %v970_v57, %v954_v52 }
 0xa6c   :  { %v987_v59 = vmul.f32 0.125, %v982_v56 }
 0xa6d   :  { %v985_v60 = vmul.f32 0.125, %v980_v58 }
 0xa6e   :  { %v2842_v61 = vsub.f32 %v2171_v35, %v987_v59  ;;  %v973_v62 = vpop.xlane.xlu0 %972  ;;  %v1015_v10 = vsub.f32 %v2191_v42, %v987_v59 }
 0xa6f   :  { %v2844_v63 = vsub.f32 %v819_v36, %v985_v60  ;;  %v981_v1 = vadd.f32 %v973_v62, %v957_v53  ;;  %v2848_v3 = vsub.f32 %v937_v43, %v985_v60 }
 0xa70   :  { %v995_v2 = vmul.f32 %v2842_v61, %v2842_v61  ;;  %v1019_v17 = vmul.f32 %v1015_v10, %v1015_v10 }
 0xa71   :  { %v993_v6 = vmul.f32 %v2844_v63, %v2844_v63  ;;  %v986_v7 = vmul.f32 0.125, %v981_v1  ;;  %v1017_v12 = vmul.f32 %v2848_v3, %v2848_v3 }
 0xa72   :  { %v979_v4 = vpop.xlane.xlu0 %978  ;;  %v1003_v5 = vsel %vm744_vm5, %v995_v2, 0.0  ;;  %v1027_v21 = vsel %vm744_vm5, %v1019_v17, 0.0 }
 0xa73   :  { %v983_v8 = vadd.f32 %v979_v4, %v963_v54  ;;  %1004 = vadd.xlane.f32.xlu1 %v1003_v5  ;;  %v997_v11 = vsel %vm744_vm5, %v993_v6, 0.0  ;;  %v990_v13 = vsub.f32 %v822_v40, %v986_v7  ;;  %v1021_v16 = vsel %vm744_vm5, %v1017_v12, 0.0 }
 0xa74   :  { %v1014_v18 = vsub.f32 %v940_v47, %v986_v7 }
 0xa75   :  { %v988_v9 = vmul.f32 0.125, %v983_v8  ;;  %v994_v20 = vmul.f32 %v990_v13, %v990_v13 }
 0xa76   :  { %v1018_v24 = vmul.f32 %v1014_v18, %v1014_v18 }
 0xa77   :  { %v2856_v14 = vsub.f32 %v2172_v39, %v988_v9  ;;  %998 = vadd.xlane.f32.xlu1 %v997_v11  ;;  %v2863_v22 = vsub.f32 %v2192_v45, %v988_v9  ;;  %v1000_v23 = vsel %vm744_vm5, %v994_v20, 0.0 }
 0xa78   :  { %v1024_v25 = vsel %vm744_vm5, %v1018_v24, 0.0 }
 0xa79   :  { %v996_v15 = vmul.f32 %v2856_v14, %v2856_v14  ;;  %v1020_v26 = vmul.f32 %v2863_v22, %v2863_v22 }
 0xa7b   :  { %1022 = vadd.xlane.f32.xlu1 %v1021_v16  ;;  %v1006_v19 = vsel %vm744_vm5, %v996_v15, 0.0  ;;  %v1030_v27 = vsel %vm744_vm5, %v1020_v26, 0.0 }
 0xa7c   :  { %1007 = vadd.xlane.f32.xlu0 %v1006_v19  ;;  %v2526_v19 = vmov 0  }
 0xa7d   :  { %1205 = vmatprep.subr.bf16.mxu0 %v2526_v19  ;;  %1351 = vmatprep.subr.bf16.mxu1 %v2526_v19 }
 0xa7f   :  { %1028 = vadd.xlane.f32.xlu1 %v1027_v21 }
 0xa80   :  { %1001 = vadd.xlane.f32.xlu0 %v1000_v23 }
 0xa84   :  { %1025 = vadd.xlane.f32.xlu0 %v1024_v25 }
 0xa88   :  { %1031 = vadd.xlane.f32.xlu0 %v1030_v27 }
 0xb00   :  { %v1005_v30 = vpop.xlane.xlu1 %1004 }
 0xb04   :  { %v999_v31 = vpop.xlane.xlu1 %998 }
 0xb08   :  { %v1023_v32 = vpop.xlane.xlu1 %1022 }
 0xb09   :  { %v1033_v33 = vadd.f32 %v1023_v32, %v999_v31  ;;  %v1008_v34 = vpop.xlane.xlu0 %1007 }
 0xb0b   :  { %v1037_v35 = vmul.f32 0.125, %v1033_v33 }
 0xb0c   :  { %v1029_v36 = vpop.xlane.xlu1 %1028 }
 0xb0d   :  { %v1041_v37 = vadd.f32 1e-05, %v1037_v35  ;;  %v1035_v38 = vadd.f32 %v1029_v36, %v1005_v30  ;;  %v1002_v39 = vpop.xlane.xlu0 %1001  ;;  %v2290_v36 = vld [vmem:[%s3051_s4 + $0x4] ss:$8 sps:$4 sm:$0xff]  }
 0xb0f   :  { %v1039_v40 = vmul.f32 0.125, %v1035_v38  ;;  %2303 = vrsqrt.f32 %v1041_v37 }
 0xb11   :  { %v1043_v41 = vadd.f32 1e-05, %v1039_v40  ;;  %v1026_v42 = vpop.xlane.xlu0 %1025 }
 0xb12   :  { %v1034_v43 = vadd.f32 %v1026_v42, %v1002_v39 }
 0xb13   :  { %2305 = vrsqrt.f32 %v1043_v41 }
 0xb14   :  { %v1038_v44 = vmul.f32 0.125, %v1034_v43 }
 0xb15   :  { %v1032_v45 = vpop.xlane.xlu0 %1031 }
 0xb16   :  { %v1042_v46 = vadd.f32 1e-05, %v1038_v44  ;;  %v1036_v47 = vadd.f32 %v1032_v45, %v1008_v34 }
 0xb18   :  { %2307 = vrsqrt.f32 %v1042_v46  ;;  %v1040_v48 = vmul.f32 0.125, %v1036_v47 }
 0xb19   :  { %v2304_v50 = vpop.eup %2303 }
 0xb1a   :  { %v1044_v49 = vadd.f32 1e-05, %v1040_v48  ;;  %v1049_v51 = vmul.f32 %v2304_v50, %v2844_v63  ;;  %v1053_v52 = vmul.f32 %v2304_v50, %v2848_v3 }
 0xb1c   :  { %2309 = vrsqrt.f32 %v1044_v49  ;;  %v1061_v57 = vmul.f32 0.2, %v1049_v51  ;;  %v1073_v58 = vmul.f32 0.2, %v1053_v52  ;;  %vm1057_vm10 = vcmp.gt.f32.partialorder %v1049_v51, 0.0 }
 0xb1d   :  { %v2306_v53 = vpop.eup %2305  ;;  %vm1069_vm11 = vcmp.gt.f32.partialorder %v1053_v52, 0.0 }
 0xb1e   :  { %v1051_v55 = vmul.f32 %v2306_v53, %v2842_v61  ;;  %v1055_v56 = vmul.f32 %v2306_v53, %v1015_v10  ;;  %v1065_v4 = vsel %vm1057_vm10, %v1049_v51, %v1061_v57  ;;  %v1077_v63 = vsel %vm1069_vm11, %v1053_v52, %v1073_v58 }
 0xb20   :  { %v1063_v5 = vmul.f32 0.2, %v1051_v55  ;;  %v1075_v3 = vmul.f32 0.2, %v1055_v56  ;;  %vm1059_vm2 = vcmp.gt.f32.partialorder %v1051_v55, 0.0  ;;  %vm1071_vm3 = vcmp.gt.f32.partialorder %v1055_v56, 0.0 }
 0xb22   :  { %v2308_v54 = vpop.eup %2307  ;;  %v1079_v16 = vsel %vm1071_vm3, %v1055_v56, %v1075_v3  ;;  %v2292_v3 = vld [vmem:[%s3051_s4] ss:$8 sps:$4 sm:$0xff]  }
 0xb23   :  { %v1050_v59 = vmul.f32 %v2308_v54, %v990_v13  ;;  %v1054_v60 = vmul.f32 %v2308_v54, %v1014_v18  ;;  %v1067_v13 = vsel %vm1059_vm2, %v1051_v55, %v1063_v5 }
 0xb25   :  { %vm1058_vm12 = vcmp.gt.f32.partialorder %v1050_v59, 0.0  ;;  %v1062_v62 = vmul.f32 0.2, %v1050_v59  ;;  %vm1070_vm1 = vcmp.gt.f32.partialorder %v1054_v60, 0.0  ;;  %v1074_v1 = vmul.f32 0.2, %v1054_v60 }
 0xb26   :  { %v2310_v2 = vpop.eup %2309 }
 0xb27   :  { %v1052_v6 = vmul.f32 %v2310_v2, %v2856_v14  ;;  %v1056_v61 = vmul.f32 %v2310_v2, %v2863_v22  ;;  %v1066_v7 = vsel %vm1058_vm12, %v1050_v59, %v1062_v62  ;;  %v1078_v8 = vsel %vm1070_vm1, %v1054_v60, %v1074_v1 }
 0xb28   :  { %v1084_v9 = vpack.c.bf16 %v1066_v7, %v1065_v4  ;;  %v1246_v10 = vpack.c.bf16 %v1078_v8, %v1077_v63 }
 0xb29   :  { %vm1060_vm4 = vcmp.gt.f32.partialorder %v1052_v6, 0.0  ;;  %v1064_v11 = vmul.f32 0.2, %v1052_v6  ;;  %vm1072_vm6 = vcmp.gt.f32.partialorder %v1056_v61, 0.0  ;;  %v1076_v12 = vmul.f32 0.2, %v1056_v61 }
 0xb2a   :  { %2195 = vmatprep.mubr.msk.bf16.mxu0 %vm744_vm5, %v1084_v9  ;;  %2201 = vmatprep.mubr.msk.bf16.mxu1 %vm744_vm5, %v1246_v10 }
 0xb2b   :  { %v1068_v15 = vsel %vm1060_vm4, %v1052_v6, %v1064_v11  ;;  %v1080_v14 = vsel %vm1072_vm6, %v1056_v61, %v1076_v12 }
 0xb2c   :  { %v1085_v17 = vpack.c.bf16 %v1068_v15, %v1067_v13  ;;  %v1247_v18 = vpack.c.bf16 %v1080_v14, %v1079_v16 }
 0xb2e   :  { %2196 = vmatmul.mubr.msk.bf16.vlgmr.msra.gmra.mrb[20].mxu0 %vm744_vm5, %v1085_v17  ;;  %2202 = vmatmul.mubr.msk.bf16.vlgmr.msra.gmra.mrb[28].mxu1 %vm744_vm5, %v1247_v18 }
 0xb2f   :  { %2002 = vmatprep.mubr.msk.bf16.mxu0 %vm469_vm13, %v2290_v36  ;;  %2005 = vmatprep.mubr.msk.bf16.mxu1 %vm469_vm13, %v2290_v36 }
 0xc01   :  { %v2197_v20 = vpop.f32.mrb[20].mxu0  ;;  %v2203_v21 = vpop.f32.mrb[28].mxu1 }
 0xc02   :  { %v1130_v22 = vpop.f32.mrb[21].mxu0  ;;  %v1288_v23 = vpop.f32.mrb[29].mxu1 }
 0xc03   :  { %v2198_v24 = vpop.f32.mrb[22].mxu0  ;;  %v2204_v25 = vpop.f32.mrb[30].mxu1 }
 0xc04   :  { %v1146_v26 = vpack.c.bf16 %v2198_v24, %v2197_v20  ;;  %v1304_v27 = vpack.c.bf16 %v2204_v25, %v2203_v21  ;;  %v1133_v28 = vpop.f32.mrb[23].mxu0  ;;  %v1291_v29 = vpop.f32.mrb[31].mxu1 }
 0xc05   :  { %v1145_v30 = vpack.c.bf16 %v1133_v28, %v1130_v22  ;;  %v1303_v31 = vpack.c.bf16 %v1291_v29, %v1288_v23 }
 0xc06   :  { %1148 = vst.msk [vmem:[#allocation2 + $0x8] sm:$0xff] %vm617_vm14, %v1146_v26  ;;  %1306 = vst.msk [vmem:[#allocation2 + $0x58] sm:$0xff] %vm617_vm14, %v1304_v27 }
 0xc07   :  { %1147 = vst.msk [vmem:[#allocation2] sm:$0xff] %vm617_vm14, %v1145_v30  ;;  %1305 = vst.msk [vmem:[#allocation2 + $0x50] sm:$0xff] %vm617_vm14, %v1303_v31  ;;  %1309 = vrot.lane.b32.xlu0 %v1303_v31, %s2521_s0  ;;  %1151 = vrot.lane.b32.xlu1 %v1145_v30, %s2521_s0 }
 0xc0b   :  { %1159 = vrot.lane.b32.xlu0 %v1145_v30, %s2519_s6  ;;  %1153 = vrot.lane.b32.xlu1 %v1146_v26, %s2521_s0 }
 0xc0d   :  { %v1342_v34 = vld [vmem:[#allocation2 + $0x58] sm:$0xff]  ;;  %v1184_v35 = vld [vmem:[#allocation2 + $0x8] sm:$0xff] }
 0xc0e   :  { %v1341_v32 = vld [vmem:[#allocation2 + $0x50] sm:$0xff]  ;;  %v1183_v33 = vld [vmem:[#allocation2] sm:$0xff] }
 0xc0f   :  { %1352 = vmatpush1.bf16.msra.mxu1 %v1341_v32  ;;  %1161 = vrot.lane.b32.xlu0 %v1146_v26, %s2519_s6 }
 0xc10   :  { %1311 = vrot.lane.b32.xlu1 %v1304_v27, %s2521_s0  ;;  %1206 = vmatpush1.bf16.msra.mxu0 %v1183_v33 }
 0xc11   :  { %1207 = vmatprep.subr.bf16.mxu0 %v2526_v19  ;;  %1353 = vmatprep.subr.bf16.mxu1 %v2526_v19 }
 0xc13   :  { %1354 = vmatpush1.bf16.msra.mxu1 %v1342_v34  ;;  %1167 = vrot.lane.b32.xlu0 %v1145_v30, %s2522_s14 }
 0xc14   :  { %1317 = vrot.lane.b32.xlu1 %v1303_v31, %s2519_s6  ;;  %1208 = vmatpush1.bf16.msra.mxu0 %v1184_v35 }
 0xc15   :  { %1355 = vmatprep.subr.bf16.mxu1 %v2526_v19  ;;  %1209 = vmatprep.subr.bf16.mxu0 %v2526_v19 }
 0xc17   :  { %1169 = vrot.lane.b32.xlu0 %v1146_v26, %s2522_s14 }
 0xc18   :  { %1319 = vrot.lane.b32.xlu1 %v1304_v27, %s2519_s6 }
 0xc1b   :  { %1175 = vrot.lane.b32.xlu0 %v1145_v30, %s2520_s25 }
 0xc1c   :  { %1325 = vrot.lane.b32.xlu1 %v1303_v31, %s2522_s14 }
 0xc1f   :  { %1177 = vrot.lane.b32.xlu0 %v1146_v26, %s2520_s25 }
 0xc20   :  { %1327 = vrot.lane.b32.xlu1 %v1304_v27, %s2522_s14 }
 0xc24   :  { %1333 = vrot.lane.b32.xlu1 %v1303_v31, %s2520_s25 }
 0xc28   :  { %1335 = vrot.lane.b32.xlu1 %v1304_v27, %s2520_s25 }
 0xc79   :  { %v1310_v37 = vpop.permute.xlu0 %1309  ;;  %v1152_v38 = vpop.permute.xlu1 %1151 }
 0xc7a   :  { %1315 = vst.msk [vmem:[#allocation2 + $0x60] sm:$0xff] %vm617_vm14, %v1310_v37  ;;  %1157 = vst.msk [vmem:[#allocation2 + $0x10] sm:$0xff] %vm617_vm14, %v1152_v38 }
 0xc7d   :  { %v1160_v39 = vpop.permute.xlu0 %1159  ;;  %v1154_v40 = vpop.permute.xlu1 %1153 }
 0xc7e   :  { %1165 = vst.msk [vmem:[#allocation2 + $0x20] sm:$0xff] %vm617_vm14, %v1160_v39  ;;  %1158 = vst.msk [vmem:[#allocation2 + $0x18] sm:$0xff] %vm617_vm14, %v1154_v40  ;;  %v2293_v40 = vld [vmem:[#allocation14] sm:$0x3f]  }
 0xc81   :  { %v1162_v41 = vpop.permute.xlu0 %1161  ;;  %v1185_v42 = vld [vmem:[#allocation2 + $0x10] sm:$0xff]  ;;  %v1343_v43 = vld [vmem:[#allocation2 + $0x60] sm:$0xff] }
 0xc82   :  { %1166 = vst.msk [vmem:[#allocation2 + $0x28] sm:$0xff] %vm617_vm14, %v1162_v41  ;;  %v1312_v44 = vpop.permute.xlu1 %1311  ;;  %1210 = vmatpush1.bf16.msra.mxu0 %v1185_v42  ;;  %1356 = vmatpush1.bf16.msra.mxu1 %v1343_v43  ;;  %v1461_v41 = vsel %vm698_vm15, %v2293_v40, 0 }
 0xc83   :  { %1316 = vst.msk [vmem:[#allocation2 + $0x68] sm:$0xff] %vm617_vm14, %v1312_v44  ;;  %1211 = vmatprep.subr.bf16.mxu0 %v2526_v19  ;;  %1357 = vmatprep.subr.bf16.mxu1 %v2526_v19 }
 0xc85   :  { %v1168_v45 = vpop.permute.xlu0 %1167  ;;  %v1186_v46 = vld [vmem:[#allocation2 + $0x18] sm:$0xff]  ;;  %v1187_v49 = vld [vmem:[#allocation2 + $0x20] sm:$0xff] }
 0xc86   :  { %1173 = vst.msk [vmem:[#allocation2 + $0x30] sm:$0xff] %vm617_vm14, %v1168_v45  ;;  %v1318_v47 = vpop.permute.xlu1 %1317  ;;  %1212 = vmatpush1.bf16.msra.mxu0 %v1186_v46 }
 0xc87   :  { %1323 = vst.msk [vmem:[#allocation2 + $0x70] sm:$0xff] %vm617_vm14, %v1318_v47  ;;  %1213 = vmatprep.subr.bf16.mxu0 %v2526_v19 }
 0xc89   :  { %v1170_v48 = vpop.permute.xlu0 %1169  ;;  %v1188_v53 = vld [vmem:[#allocation2 + $0x28] sm:$0xff] }
 0xc8a   :  { %1174 = vst.msk [vmem:[#allocation2 + $0x38] sm:$0xff] %vm617_vm14, %v1170_v48  ;;  %v1320_v50 = vpop.permute.xlu1 %1319  ;;  %1214 = vmatpush1.bf16.msra.mxu0 %v1187_v49  ;;  %v1344_v51 = vld [vmem:[#allocation2 + $0x68] sm:$0xff] }
 0xc8b   :  { %1324 = vst.msk [vmem:[#allocation2 + $0x78] sm:$0xff] %vm617_vm14, %v1320_v50  ;;  %1358 = vmatpush1.bf16.msra.mxu1 %v1344_v51  ;;  %1215 = vmatprep.subr.bf16.mxu0 %v2526_v19 }
 0xc8c   :  { %1359 = vmatprep.subr.bf16.mxu1 %v2526_v19 }
 0xc8d   :  { %v1176_v52 = vpop.permute.xlu0 %1175  ;;  %v1189_v57 = vld [vmem:[#allocation2 + $0x30] sm:$0xff] }
 0xc8e   :  { %1181 = vst.msk [vmem:[#allocation2 + $0x40] sm:$0xff] %vm617_vm14, %v1176_v52  ;;  %v1326_v54 = vpop.permute.xlu1 %1325  ;;  %1216 = vmatpush1.bf16.msra.mxu0 %v1188_v53  ;;  %v1345_v55 = vld [vmem:[#allocation2 + $0x70] sm:$0xff] }
 0xc8f   :  { %1331 = vst.msk [vmem:[#allocation2 + $0x80] sm:$0xff] %vm617_vm14, %v1326_v54  ;;  %1360 = vmatpush1.bf16.msra.mxu1 %v1345_v55  ;;  %1217 = vmatprep.subr.bf16.mxu0 %v2526_v19 }
 0xc90   :  { %1361 = vmatprep.subr.bf16.mxu1 %v2526_v19 }
 0xc91   :  { %v1178_v56 = vpop.permute.xlu0 %1177  ;;  %v1190_v60 = vld [vmem:[#allocation2 + $0x38] sm:$0xff] }
 0xc92   :  { %1182 = vst.msk [vmem:[#allocation2 + $0x48] sm:$0xff] %vm617_vm14, %v1178_v56  ;;  %v1328_v58 = vpop.permute.xlu1 %1327  ;;  %1218 = vmatpush1.bf16.msra.mxu0 %v1189_v57  ;;  %v1346_v59 = vld [vmem:[#allocation2 + $0x78] sm:$0xff] }
 0xc93   :  { %1332 = vst.msk [vmem:[#allocation2 + $0x88] sm:$0xff] %vm617_vm14, %v1328_v58  ;;  %1362 = vmatpush1.bf16.msra.mxu1 %v1346_v59  ;;  %1219 = vmatprep.subr.bf16.mxu0 %v2526_v19 }
 0xc94   :  { %1363 = vmatprep.subr.bf16.mxu1 %v2526_v19 }
 0xc95   :  { %v1191_v2 = vld [vmem:[#allocation2 + $0x40] sm:$0xff] }
 0xc96   :  { %v1334_v62 = vpop.permute.xlu1 %1333  ;;  %1220 = vmatpush1.bf16.msra.mxu0 %v1190_v60  ;;  %v1347_v1 = vld [vmem:[#allocation2 + $0x80] sm:$0xff] }
 0xc97   :  { %1339 = vst.msk [vmem:[#allocation2 + $0x90] sm:$0xff] %vm617_vm14, %v1334_v62  ;;  %1364 = vmatpush1.bf16.msra.mxu1 %v1347_v1  ;;  %1221 = vmatprep.subr.bf16.mxu0 %v2526_v19 }
 0xc98   :  { %1365 = vmatprep.subr.bf16.mxu1 %v2526_v19 }
 0xc99   :  { %v1192_v5 = vld [vmem:[#allocation2 + $0x48] sm:$0xff] }
 0xc9a   :  { %v1336_v4 = vpop.permute.xlu1 %1335  ;;  %1222 = vmatpush1.bf16.msra.mxu0 %v1191_v2  ;;  %v1348_v63 = vld [vmem:[#allocation2 + $0x88] sm:$0xff] }
 0xc9b   :  { %1340 = vst.msk [vmem:[#allocation2 + $0x98] sm:$0xff] %vm617_vm14, %v1336_v4  ;;  %1366 = vmatpush1.bf16.msra.mxu1 %v1348_v63  ;;  %1223 = vmatprep.subr.bf16.mxu0 %v2526_v19 }
 0xc9c   :  { %1367 = vmatprep.subr.bf16.mxu1 %v2526_v19 }
 0xc9e   :  { %1224 = vmatpush1.bf16.msra.mxu0 %v1192_v5  ;;  %v1349_v6 = vld [vmem:[#allocation2 + $0x90] sm:$0xff] }
 0xc9f   :  { %1368 = vmatpush1.bf16.msra.mxu1 %v1349_v6  ;;  %2205 = vmatprep.subr.bf16.mxu0 %v2516_v0 }
 0xca0   :  { %1369 = vmatprep.subr.bf16.mxu1 %v2526_v19 }
 0xca1   :  { %1238 = vmatmul.mubr.bf16.vlgmr.msra.gmra.mrb[24].mxu0 %v2292_v3 }
 0xca2   :  { %v1350_v61 = vld [vmem:[#allocation2 + $0x98] sm:$0xff]  ;;  %2207 = vmatprep.mubr.msk.bf16.mxu0 %vm2517_vm0, %v2516_v0  ;;  %2206 = vmatpush3.bf16.msra.mxu0 %v1461_v41 }
 0xca3   :  { %1370 = vmatpush1.bf16.msra.mxu1 %v1350_v61  ;;  %2211 = vmatprep.subr.bf16.mxu0 %v2516_v0 }
 0xca4   :  { %2223 = vmatprep.subr.bf16.mxu1 %v2516_v0 }
 0xca6   :  { %1384 = vmatmul.mubr.bf16.vlgmr.msra.gmra.mrb[32].mxu1 %v2292_v3 }
 0xca7   :  { %2225 = vmatprep.mubr.msk.bf16.mxu1 %vm2517_vm0, %v2516_v0  ;;  %2224 = vmatpush3.bf16.msra.mxu1 %v1461_v41 }
 0xca8   :  { %2229 = vmatprep.subr.bf16.mxu1 %v2516_v0 }
 0xd74   :  { %v1239_v7 = vpop.f32.mrb[24].mxu0 }
 0xd75   :  { %v1392_v8 = vsel %vm617_vm14, %v1239_v7, 0.0  ;;  %v1241_v9 = vpop.f32.mrb[25].mxu0 }
 0xd76   :  { %1393 = vadd.xlane.f32.xlu0 %v1392_v8  ;;  %v1242_v10 = vpop.f32.mrb[26].mxu0 }
 0xd77   :  { %v1244_v11 = vpop.f32.mrb[27].mxu0  ;;  %v1395_v12 = vsel %vm617_vm14, %v1242_v10, 0.0 }
 0xd78   :  { %1396 = vadd.xlane.f32.xlu1 %v1395_v12 }
 0xd79   :  { %v1385_v13 = vpop.f32.mrb[32].mxu1 }
 0xd7a   :  { %v1387_v15 = vpop.f32.mrb[33].mxu1  ;;  %v1400_v16 = vsel %vm617_vm14, %v1385_v13, 0.0 }
 0xd7b   :  { %1401 = vadd.xlane.f32.xlu0 %v1400_v16  ;;  %v1388_v14 = vpop.f32.mrb[34].mxu1 }
 0xd7c   :  { %v1390_v17 = vpop.f32.mrb[35].mxu1  ;;  %v1403_v18 = vsel %vm617_vm14, %v1388_v14, 0.0 }
 0xd7f   :  { %1404 = vadd.xlane.f32.xlu0 %v1403_v18 }
 0xe03   :  { %v1394_v20 = vpop.xlane.xlu0 %1393 }
 0xe05   :  { %v1397_v24 = vpop.xlane.xlu1 %1396 }
 0xe08   :  { %v1402_v21 = vpop.xlane.xlu0 %1401 }
 0xe09   :  { %v1406_v22 = vadd.f32 %v1402_v21, %v1394_v20 }
 0xe0b   :  { %v1408_v23 = vmul.f32 0.041666668, %v1406_v22 }
 0xe0c   :  { %v1405_v25 = vpop.xlane.xlu0 %1404 }
 0xe0d   :  { %v1410_v26 = vsub.f32 %v1239_v7, %v1408_v23  ;;  %v1422_v27 = vsub.f32 %v1385_v13, %v1408_v23  ;;  %v1407_v28 = vadd.f32 %v1405_v25, %v1397_v24  ;;  %v1448_v25 = vld [vmem:[#allocation6] sm:$0xf] }
 0xe0f   :  { %v1409_v29 = vmul.f32 0.041666668, %v1407_v28  ;;  %v1412_v30 = vmul.f32 %v1410_v26, %v1410_v26  ;;  %v1424_v34 = vmul.f32 %v1422_v27, %v1422_v27 }
 0xe11   :  { %v1411_v31 = vsub.f32 %v1242_v10, %v1409_v29  ;;  %v1423_v32 = vsub.f32 %v1388_v14, %v1409_v29  ;;  %v1414_v33 = vsel %vm617_vm14, %v1412_v30, 0.0  ;;  %v1426_v36 = vsel %vm617_vm14, %v1424_v34, 0.0 }
 0xe12   :  { %1415 = vadd.xlane.f32.xlu1 %v1414_v33 }
 0xe13   :  { %v1413_v35 = vmul.f32 %v1411_v31, %v1411_v31  ;;  %v1425_v38 = vmul.f32 %v1423_v32, %v1423_v32 }
 0xe15   :  { %v1417_v37 = vsel %vm617_vm14, %v1413_v35, 0.0  ;;  %v1429_v39 = vsel %vm617_vm14, %v1425_v38, 0.0 }
 0xe16   :  { %1427 = vadd.xlane.f32.xlu1 %v1426_v36  ;;  %1418 = vadd.xlane.f32.xlu0 %v1417_v37 }
 0xe1a   :  { %1430 = vadd.xlane.f32.xlu0 %v1429_v39 }
 0xe9f   :  { %v1416_v42 = vpop.xlane.xlu1 %1415 }
 0xea3   :  { %v1419_v43 = vpop.xlane.xlu0 %1418  ;;  %v1428_v44 = vpop.xlane.xlu1 %1427 }
 0xea4   :  { %v1432_v45 = vadd.f32 %v1428_v44, %v1416_v42 }
 0xea6   :  { %v1434_v46 = vmul.f32 0.041666668, %v1432_v45 }
 0xea7   :  { %v1431_v47 = vpop.xlane.xlu0 %1430 }
 0xea8   :  { %v1436_v48 = vadd.f32 1e-05, %v1434_v46  ;;  %v1433_v49 = vadd.f32 %v1431_v47, %v1419_v43  ;;  %v2294_v46 = vld [vmem:[%s3059_s12] ss:$8 sps:$4 sm:$0xff]   ;;  %v2296_v47 = vld [vmem:[%s3059_s12 + $0x4] ss:$8 sps:$4 sm:$0xff]  }
 0xeaa   :  { %2311 = vrsqrt.f32 %v1436_v48  ;;  %v1435_v50 = vmul.f32 0.041666668, %v1433_v49  ;;  %v1703_v48 = vld [vmem:[%s3059_s12 + $0x10] sm:$0xff]  ;;  %s2527_s12 = smov 32  }
 0xeab   :  { %v2014_v49 = vcombine.high %v1703_v48, %v1703_v48 }
 0xeac   :  { %v1437_v51 = vadd.f32 1e-05, %v1435_v50  ;;  %v2013_v50 = vcombine.low %v1703_v48, %v1703_v48 }
 0xeae   :  { %2313 = vrsqrt.f32 %v1437_v51  ;;  %v1724_v51 = vsel %vm400_vm7, %v2013_v50, 0 }
 0xeb4   :  { %v2312_v52 = vpop.eup %2311 }
 0xeb5   :  { %v1440_v53 = vmul.f32 %v2312_v52, %v1410_v26  ;;  %v1442_v54 = vmul.f32 %v2312_v52, %v1422_v27 }
 0xeb7   :  { %v1444_v58 = vmax.f32 %v1440_v53, 0.0  ;;  %v1446_v59 = vmax.f32 %v1442_v54, 0.0 }
 0xeb8   :  { %v2314_v55 = vpop.eup %2313 }
 0xeb9   :  { %v1441_v56 = vmul.f32 %v2314_v55, %v1411_v31  ;;  %v1443_v57 = vmul.f32 %v2314_v55, %v1423_v32 }
 0xebb   :  { %v1445_v60 = vmax.f32 %v1441_v56, 0.0  ;;  %v1447_v62 = vmax.f32 %v1443_v57, 0.0 }
 0xebd   :  { %v1451_v1 = vpack.c.bf16 %v1445_v60, %v1444_v58  ;;  %v1567_v2 = vpack.c.bf16 %v1447_v62, %v1446_v59 }
 0xebf   :  { %2208 = vmatmul.mubr.msk.bf16.vlgmr.msra.gmra.mrb[28].mxu0 %vm617_vm14, %v1451_v1  ;;  %2226 = vmatmul.mubr.msk.bf16.vlgmr.msra.gmra.mrb[36].mxu1 %vm617_vm14, %v1567_v2  ;;  %vm1523_vm14 = vcmask 523264  }
 0xec0   :  { %2219 = vmatprep.mubr.msk.bf16.mxu0 %vm2517_vm0, %v2516_v0  ;;  %2237 = vmatprep.mubr.msk.bf16.mxu1 %vm2517_vm0, %v2516_v0 }
 0xf92   :  { %v1497_v4 = vpop.f32.mrb[28].mxu0  ;;  %v1605_v63 = vpop.f32.mrb[36].mxu1 }
 0xf93   :  { %v2209_v5 = vpop.f32.mrb[29].mxu0  ;;  %v2227_v3 = vpop.f32.mrb[37].mxu1 }
 0xf94   :  { %v1500_v6 = vpop.f32.mrb[30].mxu0  ;;  %v1608_v61 = vpop.f32.mrb[38].mxu1 }
 0xf95   :  { %v1504_v7 = vpack.c.bf16 %v1500_v6, %v1497_v4  ;;  %v1612_v8 = vpack.c.bf16 %v1608_v61, %v1605_v63  ;;  %v2210_v9 = vpop.f32.mrb[31].mxu0  ;;  %v2228_v10 = vpop.f32.mrb[39].mxu1 }
 0xf97   :  { %1505 = vst.msk [vmem:[#allocation2] sm:$0xff] %vm396_vm9, %v1504_v7  ;;  %1613 = vst.msk [vmem:[#allocation2 + $0x50] sm:$0xff] %vm396_vm9, %v1612_v8  ;;  %1615 = vrot.lane.b32.xlu0 %v1612_v8, %s2519_s6  ;;  %1507 = vrot.lane.b32.xlu1 %v1504_v7, %s2519_s6 }
 0xf9b   :  { %1515 = vrot.lane.b32.xlu0 %v1504_v7, %s2518_s7  ;;  %1511 = vrot.lane.b32.xlu1 %v1504_v7, %s2520_s25 }
 0xf9e   :  { %v1627_v11 = vld [vmem:[#allocation2 + $0x50] sm:$0xff]  ;;  %v1519_v12 = vld [vmem:[#allocation2] sm:$0xff] }
 0xf9f   :  { %2230 = vmatpush3.bf16.msra.mxu1 %v1627_v11  ;;  %1619 = vrot.lane.b32.xlu1 %v1612_v8, %s2520_s25 }
 0xfa0   :  { %2212 = vmatpush3.bf16.msra.mxu0 %v1519_v12  ;;  %2231 = vmatprep.subr.bf16.mxu1 %v2516_v0 }
 0xfa1   :  { %2213 = vmatprep.subr.bf16.mxu0 %v2516_v0 }
 0xfa3   :  { %1623 = vrot.lane.b32.xlu1 %v1612_v8, %s2518_s7  ;;  %s1959_s7 = sshll.u32 %s2528_s8, 4  ;;  %s1960_s7 = int_to_ptr.vmem [resolvable:$true] %s1959_s7 }
 0xfa4   :  { %s2475_s6 = scalar_lea.vmem %s1960_s7, 128  ;;  %p2480_p1 = scmp.lt.s32.totalorder %s1960_s7, %s1960_s7 }
 0xfa5   :  { %p2476_p0 = scmp.ne.s32.totalorder %s1960_s7, %s2475_s6  ;;  %p2481_p2 = scmp.lt.s32.totalorder %s2475_s6, %s2475_s6 }
 0xfa7   :  { %p2482_p3 = por %p2481_p2, %p2480_p1 }
 0xfa9   :  { %p2483_p4 = pnand %p2482_p3, %p2476_p0 }
0x1009   :  { %v1616_v13 = vpop.permute.xlu0 %1615  ;;  %v1508_v15 = vpop.permute.xlu1 %1507 }
0x100a   :  { %1618 = vst.msk [vmem:[#allocation2 + $0x58] sm:$0xff] %vm396_vm9, %v1616_v13  ;;  %1510 = vst.msk [vmem:[#allocation2 + $0x8] sm:$0xff] %vm396_vm9, %v1508_v15 }
0x100d   :  { %v1516_v16 = vpop.permute.xlu0 %1515  ;;  %v1512_v14 = vpop.permute.xlu1 %1511 }
0x100e   :  { %1518 = vst.msk [vmem:[#allocation2 + $0x18] sm:$0xff] %vm396_vm9, %v1516_v16  ;;  %1514 = vst.msk [vmem:[#allocation2 + $0x10] sm:$0xff] %vm396_vm9, %v1512_v14 }
0x1011   :  { %v1620_v17 = vpop.permute.xlu1 %1619  ;;  %v1520_v18 = vld [vmem:[#allocation2 + $0x8] sm:$0xff]  ;;  %v1628_v20 = vld [vmem:[#allocation2 + $0x58] sm:$0xff] }
0x1012   :  { %1622 = vst.msk [vmem:[#allocation2 + $0x60] sm:$0xff] %vm396_vm9, %v1620_v17  ;;  %2214 = vmatpush3.bf16.msra.mxu0 %v1520_v18  ;;  %2232 = vmatpush3.bf16.msra.mxu1 %v1628_v20 }
0x1013   :  { %2215 = vmatprep.subr.bf16.mxu0 %v2516_v0  ;;  %2233 = vmatprep.subr.bf16.mxu1 %v2516_v0 }
0x1015   :  { %v1624_v21 = vpop.permute.xlu1 %1623  ;;  %v1521_v22 = vld [vmem:[#allocation2 + $0x10] sm:$0xff]  ;;  %v1522_v23 = vld [vmem:[#allocation2 + $0x18] sm:$0xff] }
0x1016   :  { %1626 = vst.msk [vmem:[#allocation2 + $0x68] sm:$0xff] %vm396_vm9, %v1624_v21  ;;  %2216 = vmatpush3.bf16.msra.mxu0 %v1521_v22 }
0x1017   :  { %2217 = vmatprep.subr.bf16.mxu0 %v2516_v0 }
0x1019   :  { %v1629_v24 = vld [vmem:[#allocation2 + $0x60] sm:$0xff] }
0x101a   :  { %2218 = vmatpush3.bf16.msra.mxu0 %v1522_v23  ;;  %2234 = vmatpush3.bf16.msra.mxu1 %v1629_v24 }
0x101b   :  { %2235 = vmatprep.subr.bf16.mxu1 %v2516_v0  ;;  %1729 = vmatprep.subr.bf16.mxu0 %v2296_v47 }
0x101d   :  { %v1630_v26 = vld [vmem:[#allocation2 + $0x68] sm:$0xff]  ;;  %2220 = vmatmul.mubr.msk.bf16.vlgmr.msra.gmra.mrb[32].mxu0 %vm1523_vm14, %v1448_v25 }
0x101e   :  { %2236 = vmatpush3.bf16.msra.mxu1 %v1630_v26  ;;  %1761 = vmatprep.mubr.bf16.mxu0 %v2526_v19 }
0x101f   :  { %1844 = vmatprep.subr.bf16.mxu1 %v2296_v47  ;;  %1730 = vmatpush1.bf16.msra.mxu0 %v2294_v46 }
0x1020   :  { %2015 = vmatprep.subr.msk.bf16.mxu0 %vm400_vm7, %v2014_v49 }
0x1021   :  { %2238 = vmatmul.mubr.msk.bf16.vlgmr.msra.gmra.mrb[40].mxu1 %vm1523_vm14, %v1448_v25 }
0x1022   :  { %1876 = vmatprep.mubr.bf16.mxu1 %v2526_v19  ;;  %1845 = vmatpush1.bf16.msra.mxu1 %v2294_v46 }
0x1023   :  { %2018 = vmatprep.subr.msk.bf16.mxu1 %vm400_vm7, %v2014_v49  ;;  %1732 = vmatpush1.bf16.msra.mxu0 %v1724_v51  ;;  %vm1772_vm7 = vcmask 388096  }
0x1024   :  { %2241 = vmatprep.subr.bf16.mxu0 %v2516_v0 }
0x1026   :  { %1847 = vmatpush1.bf16.msra.mxu1 %v1724_v51 }
0x10f0   :  { %v1561_v27 = vpop.f32.mrb[32].mxu0 }
0x10f1   :  { %v1671_v28 = vsel %vm396_vm9, %v1561_v27, 0.0  ;;  %v2221_v29 = vpop.f32.mrb[33].mxu0 }
0x10f2   :  { %1672 = vadd.xlane.f32.xlu0 %v1671_v28  ;;  %v1564_v30 = vpop.f32.mrb[34].mxu0 }
0x10f3   :  { %v2222_v31 = vpop.f32.mrb[35].mxu0  ;;  %v1700_v30 = vld [vmem:[#allocation8] sm:$0x3] }
0x10f4   :  { %v1665_v32 = vpop.f32.mrb[40].mxu1 }
0x10f5   :  { %v1675_v33 = vsel %vm396_vm9, %v1665_v32, 0.0  ;;  %v2239_v34 = vpop.f32.mrb[41].mxu1 }
0x10f6   :  { %1676 = vadd.xlane.f32.xlu1 %v1675_v33  ;;  %v1668_v35 = vpop.f32.mrb[42].mxu1 }
0x10f7   :  { %v2240_v36 = vpop.f32.mrb[43].mxu1 }
0x117f   :  { %v1673_v37 = vpop.xlane.xlu0 %1672 }
0x1183   :  { %v1677_v38 = vpop.xlane.xlu1 %1676 }
0x1184   :  { %v1678_v39 = vadd.f32 %v1677_v38, %v1673_v37 }
0x1186   :  { %v1680_v40 = vmul.f32 0.020833334, %v1678_v39 }
0x1188   :  { %v1681_v41 = vsub.f32 %v1561_v27, %v1680_v40  ;;  %v1687_v19 = vsub.f32 %v1665_v32, %v1680_v40 }
0x118a   :  { %v1682_v42 = vmul.f32 %v1681_v41, %v1681_v41  ;;  %v1688_v44 = vmul.f32 %v1687_v19, %v1687_v19 }
0x118c   :  { %v1683_v43 = vsel %vm396_vm9, %v1682_v42, 0.0  ;;  %v1689_v45 = vsel %vm396_vm9, %v1688_v44, 0.0 }
0x118d   :  { %1684 = vadd.xlane.f32.xlu0 %v1683_v43 }
0x1191   :  { %1690 = vadd.xlane.f32.xlu0 %v1689_v45 }
0x121a   :  { %v1685_v52 = vpop.xlane.xlu0 %1684 }
0x121e   :  { %v1691_v53 = vpop.xlane.xlu0 %1690 }
0x121f   :  { %v1692_v54 = vadd.f32 %v1691_v53, %v1685_v52 }
0x1221   :  { %v1693_v55 = vmul.f32 0.020833334, %v1692_v54 }
0x1223   :  { %v1694_v56 = vadd.f32 1e-05, %v1693_v55 }
0x1225   :  { %2315 = vrsqrt.f32 %v1694_v56 }
0x122f   :  { %v2316_v57 = vpop.eup %2315 }
0x1230   :  { %v1696_v58 = vmul.f32 %v2316_v57, %v1681_v41  ;;  %v1697_v59 = vmul.f32 %v2316_v57, %v1687_v19 }
0x1232   :  { %v1698_v60 = vmax.f32 %v1696_v58, 0.0  ;;  %v1699_v62 = vmax.f32 %v1697_v59, 0.0 }
0x1234   :  { %v1704_v1 = vpack.c.bf16 %v1698_v60, %v1698_v60  ;;  %v1840_v2 = vpack.c.bf16 %v1699_v62, %v1699_v62 }
0x1236   :  { %2016 = vmatmul.mubr.msk.bf16.vlgmr.msra.gmra.mrb[36].mxu0 %vm396_vm9, %v1704_v1  ;;  %2019 = vmatmul.mubr.msk.bf16.vlgmr.msra.gmra.mrb[44].mxu1 %vm396_vm9, %v1840_v2  ;;  %vm1779_vm9 = vcmask 392196  }
0x1237   :  { %2245 = vmatprep.mubr.msk.bf16.mxu0 %vm2517_vm0, %v2516_v0 }
0x1309   :  { %v1763_v4 = vpop.f32.mrb[36].mxu0  ;;  %v1878_v63 = vpop.f32.mrb[44].mxu1 }
0x130a   :  { %v1770_v5 = vpack.c.bf16 %v1763_v4, %v1763_v4  ;;  %v1885_v3 = vpack.c.bf16 %v1878_v63, %v1878_v63  ;;  %v1765_v6 = vpop.f32.mrb[37].mxu0  ;;  %v1880_v61 = vpop.f32.mrb[45].mxu1 }
0x130b   :  { %v1771_v7 = vpack.c.bf16 %v1765_v6, %v1765_v6  ;;  %v1767_v8 = vpop.f32.mrb[38].mxu0  ;;  %v1882_v9 = vpop.f32.mrb[46].mxu1  ;;  %v1886_v15 = vpack.c.bf16 %v1880_v61, %v1880_v61 }
0x130c   :  { %1773 = vst.msk [vmem:[#allocation2] sm:$0xf] %vm1772_vm7, %v1770_v5  ;;  %1887 = vst.msk [vmem:[#allocation2 + $0x50] sm:$0xf] %vm1772_vm7, %v1885_v3  ;;  %v1883_v10 = vpop.f32.mrb[47].mxu1  ;;  %1782 = vrot.lane.b32.xlu0 %v1770_v5, %s2527_s12  ;;  %v1768_v11 = vpop.f32.mrb[39].mxu0 }
0x130d   :  { %1784 = vrot.lane.b32.xlu1 %v1771_v7, %s2527_s12  ;;  %v1889_v12 = vrot.slane %v1885_v3, 4  ;;  %v1775_v13 = vrot.slane %v1770_v5, 4  ;;  %v1790_v16 = vrot.slane %v1771_v7, 4  ;;  %v1902_v14 = vrot.slane %v1886_v15, 4 }
0x1310   :  { %1890 = vrot.lane.b32.xlu0 %v1889_v12, %s2520_s25 }
0x1311   :  { %1776 = vrot.lane.b32.xlu1 %v1775_v13, %s2520_s25 }
0x1314   :  { %1897 = vrot.lane.b32.xlu0 %v1886_v15, %s2527_s12 }
0x1315   :  { %1791 = vrot.lane.b32.xlu1 %v1790_v16, %s2525_s19 }
0x1319   :  { %1895 = vrot.lane.b32.xlu1 %v1885_v3, %s2527_s12 }
0x131d   :  { %1903 = vrot.lane.b32.xlu1 %v1902_v14, %s2525_s19 }
0x137e   :  { %v1783_v17 = vpop.permute.xlu0 %1782 }
0x137f   :  { %v1785_v18 = vpop.permute.xlu1 %1784 }
0x1380   :  { %v1787_v20 = vsel %vm469_vm13, %v1783_v17, %v1785_v18 }
0x1381   :  { %1789 = vst.msk [vmem:[#allocation2 + $0x8] sm:$0xf] %vm1772_vm7, %v1787_v20 }
0x1382   :  { %v1891_v21 = vpop.permute.xlu0 %1890 }
0x1383   :  { %1893 = vst.msk [vmem:[#allocation2 + $0x50] sm:$0xf0] %vm1779_vm9, %v1891_v21  ;;  %v1777_v22 = vpop.permute.xlu1 %1776 }
0x1384   :  { %1780 = vst.msk [vmem:[#allocation2] sm:$0xf0] %vm1779_vm9, %v1777_v22 }
0x1386   :  { %v1898_v24 = vpop.permute.xlu0 %1897 }
0x1387   :  { %v1792_v23 = vpop.permute.xlu1 %1791 }
0x1388   :  { %1794 = vst.msk [vmem:[#allocation2 + $0x8] sm:$0xf0] %vm1779_vm9, %v1792_v23 }
0x138a   :  { %v1907_v31 = vld [vmem:[#allocation2 + $0x50] sm:$0xff] }
0x138b   :  { %v1896_v25 = vpop.permute.xlu1 %1895  ;;  %v1795_v26 = vld [vmem:[#allocation2] sm:$0xff] }
0x138c   :  { %v1899_v27 = vsel %vm469_vm13, %v1896_v25, %v1898_v24  ;;  %2242 = vmatpush3.bf16.msra.mxu0 %v1795_v26 }
0x138d   :  { %1901 = vst.msk [vmem:[#allocation2 + $0x58] sm:$0xf] %vm1772_vm7, %v1899_v27  ;;  %2243 = vmatprep.subr.bf16.mxu0 %v2516_v0 }
0x138f   :  { %v1904_v28 = vpop.permute.xlu1 %1903  ;;  %v1796_v29 = vld [vmem:[#allocation2 + $0x8] sm:$0xff] }
0x1390   :  { %1906 = vst.msk [vmem:[#allocation2 + $0x58] sm:$0xf0] %vm1779_vm9, %v1904_v28  ;;  %2244 = vmatpush3.bf16.msra.mxu0 %v1796_v29 }
0x1391   :  { %2249 = vmatprep.subr.bf16.mxu0 %v2516_v0 }
0x1393   :  { %2246 = vmatmul.mubr.msk.bf16.vlgmr.msra.gmra.mrb[40].mxu0 %vm469_vm13, %v1700_v30 }
0x1394   :  { %2250 = vmatpush3.bf16.msra.mxu0 %v1907_v31  ;;  %2253 = vmatprep.mubr.msk.bf16.mxu0 %vm2517_vm0, %v2516_v0 }
0x1395   :  { %2251 = vmatprep.subr.bf16.mxu0 %v2516_v0 }
0x1397   :  { %v1908_v32 = vld [vmem:[#allocation2 + $0x58] sm:$0xff] }
0x1398   :  { %2252 = vmatpush3.bf16.msra.mxu0 %v1908_v32 }
0x139b   :  { %2254 = vmatmul.mubr.msk.bf16.vlgmr.msra.gmra.mrb[44].mxu0 %vm469_vm13, %v1700_v30 }
0x1466   :  { %v1834_v33 = vpop.f32.mrb[40].mxu0 }
0x1467   :  { %2317 = vtanh.f32 %v1834_v33  ;;  %v2247_v34 = vpop.f32.mrb[41].mxu0 }
0x1468   :  { %v1837_v35 = vpop.f32.mrb[42].mxu0 }
0x1469   :  { %v2248_v36 = vpop.f32.mrb[43].mxu0 }
0x146e   :  { %v1943_v37 = vpop.f32.mrb[44].mxu0 }
0x146f   :  { %2319 = vtanh.f32 %v1943_v37  ;;  %v2255_v38 = vpop.f32.mrb[45].mxu0 }
0x1470   :  { %v1946_v39 = vpop.f32.mrb[46].mxu0 }
0x1471   :  { %v2318_v40 = vpop.eup %2317  ;;  %v2256_v41 = vpop.f32.mrb[47].mxu0 }
0x1472   :  { %1951 = vst.msk [vmem:[#allocation15] sm:$0xf] %vm1772_vm7, %v2318_v40 }
0x1479   :  { %v2320_v0 = vpop.eup %2319 }
0x147a   :  { %1953 = vst.msk [vmem:[#allocation15 + $0x4] sm:$0xf] %vm1772_vm7, %v2320_v0 }
0x147b   :  { %2486 = shalt.err (!%p2483_p4)
}
0x147c   :  { %s2487_s30 = scalar_lea.hbm %s3060_s13, 128 }
0x147d   :  { %p2488_p5 = scmp.ne.s32.totalorder %s3060_s13, %s2487_s30  ;;  %p2491_p6 = scmp.lt.u32.totalorder %s2487_s30, %s3060_s13 }
0x147f   :  { %p2493_p7 = pnand %p2491_p6, %p2488_p5 }
0x1481   :  { %2496 = shalt.err (!%p2493_p7)
}
0x1482   :  { %1965 = dma.vmem_to_hbm [thread:$0]  %s1960_s7, 128, %s3060_s13, [#allocation5], %s2509_s5, %s2509_s5, %s2510_s26  }
0x1483   :  { %2505 = dma.done.wait [#allocation5], 128  }
0x1484   :  { %2506 = vsyncadd [#allocation5], 4294967168 }
0x1485   :  { %1969 = vsyncpa [#allocation4], 1 }
0x1486   :  { %1970 = vsyncpa [#allocation7], 1 }
0x1487   :  { %1971 = vsyncpa [#allocation10], 1 }
0x1488   :  { %1972 = vsyncpa [#allocation13], 1 }
0x1489   :  { %1973 = vsyncpa [#allocation5], 1 }

</bundles_post_ra>
